<compile_context>
chip_gen: v6e
topology: v6e:2x2x1
jax: 0.10.0
libtpu: 0.0.40
codegen_flags: <defaults>
</compile_context>

<pallas_src>
import jax
import jax.numpy as jnp
from jax.experimental import pallas as pl
from jax.experimental.pallas import tpu as pltpu


def _round_up(x, m):
    return ((x + m - 1) // m) * m


def _cdiv(a, b):
    return -(-a // b)


def _tpu_generation(default=6):
    """Best-effort TPU generation from device_kind (e.g. 'TPU v5 lite' -> 5)."""
    try:
        kind = jax.devices()[0].device_kind.lower()
    except Exception:
        return default
    for g in (7, 6, 5, 4, 3, 2):
        if f"v{g}" in kind:
            return g
    return default


def _vmem_cap_bytes(gen):
    """Per-generation usable VMEM cap with headroom for compiler scratch."""
    cap = None
    try:
        cap = int(getattr(pltpu.get_tpu_info(), "vmem_capacity_bytes", 0)) or None
    except Exception:
        cap = None
    if cap is None or not ((16 << 20) <= cap <= (512 << 20)):
        if gen >= 7:
            cap = 64 << 20      # v7x: 64 MiB physical per TC
        elif gen >= 4:
            cap = 128 << 20     # v4/v5e/v6e: 128 MiB
        else:
            cap = 16 << 20
    return max(int(cap * 0.80), 16 << 20)


# ------------------------------ fused kernel -------------------------------- #

def _make_fused_kernel(n_cross, n_deep, collapse_cross, mxu_dtype,
                       lane_dense_out, hb_smem):
    """Builds the fused cross-stack + deep-MLP + output-head kernel body."""

    def kernel(*refs):
        it = iter(refs)
        x_ref = next(it)                          # (TB, Dp)  f32 (or bf16)
        if n_cross > 0:
            if collapse_cross:
                cw_ref = next(it)                 # (L, Dp, Dp)  mxu_dtype
            else:
                cu_ref = next(it)                 # (L, Dp, Rp)  mxu_dtype
                cv_ref = next(it)                 # (L, Rp, Dp)  mxu_dtype
            cb_ref = next(it)                     # (L, 1, Dp)   f32
        deep_refs = [next(it) for _ in range(2 * n_deep)]
        hw_xl_ref = next(it)                      # (1, Dp)      f32
        hw_deep_ref = next(it)                    # (1, Hp)      f32
        hb_ref = next(it)                         # (1,) SMEM or (1,1) VMEM f32
        out_ref = next(it)                        # (1, TB) or (TB, 1) f32

        x = x_ref[...].astype(jnp.float32)        # (TB, Dp) f32
        x0 = x
        xl = x

        # ---- cross network: xl = x0 * (xl @ U^T @ V^T) + b + xl -------------
        for l in range(n_cross):
            xl_m = xl.astype(mxu_dtype)
            if collapse_cross:
                p = jnp.dot(xl_m, cw_ref[l], preferred_element_type=jnp.float32)
            else:
                h = jnp.dot(xl_m, cu_ref[l], preferred_element_type=jnp.float32)
                p = jnp.dot(h.astype(mxu_dtype), cv_ref[l],
                            preferred_element_type=jnp.float32)
            xl = x0 * p + cb_ref[l] + xl          # f32 VPU epilogue

        # ---- deep MLP: chained Linear + ReLU, intermediates stay on-chip ----
        deep = x
        for j in range(n_deep):
            w_ref = deep_refs[2 * j]
            b_ref = deep_refs[2 * j + 1]
            y = jnp.dot(deep.astype(mxu_dtype), w_ref[...],
                        preferred_element_type=jnp.float32)
            deep = jnp.maximum(y + b_ref[...], 0.0)

        # ---- output head: VPU multiply + lane reduce; the [xl, deep] concat
        #      is replaced by two partial reductions. --------------------------
        hb = hb_ref[0] if hb_smem else hb_ref[0, 0]
        logit = (jnp.sum(xl * hw_xl_ref[...], axis=-1, keepdims=True)
                 + jnp.sum(deep * hw_deep_ref[...], axis=-1, keepdims=True)
                 + hb)
        sig = jax.nn.sigmoid(logit)               # (TB, 1) f32
        if lane_dense_out:
            out_ref[...] = sig.reshape(1, -1)     # lane-dense (1, TB) store
        else:
            out_ref[...] = sig                    # column (TB, 1) store

    return kernel


# --------------------------- one-time weight prep --------------------------- #

def prepare_kernel_params(params, *, mxu_dtype=jnp.bfloat16,
                          collapse_cross_max_dim=None, lane_multiple=128):
    """Pre-transpose / pad / (optionally) collapse weights ONCE, off the hot path."""
    assert len(params["deep"]) >= 1, "DCNv2 output head expects >=1 deep layer"
    gen = _tpu_generation()
    mxu_tile = 128 if gen <= 5 else 256           # MXU N/K tile per generation

    D = params["deep"][0][0].shape[1]             # torch Linear weight is (out, in)
    Dp = _round_up(D, lane_multiple)

    kp = {"n_cross": len(params["cross"]), "mxu_dtype": mxu_dtype,
          "d_in": D, "d_in_pad": Dp, "generation": gen,
          "vmem_cap": _vmem_cap_bytes(gen)}

    if kp["n_cross"] > 0:
        R = params["cross"][0][0].shape[0]        # u_w is (rank, D)
        Rp = _round_up(R, lane_multiple)
        if collapse_cross_max_dim is not None:
            collapse = D <= collapse_cross_max_dim
        else:
            # collapsed (Dp,Dp): ceil(Dp/T)^2 MXU passes; U/V pair: 2*ceil(Dp/T)*ceil(Rp/T)
            collapse = _cdiv(Dp, mxu_tile) <= 2 * _cdiv(Rp, mxu_tile)
        kp["collapse_cross"] = collapse

        def pad_dd(w):                            # (D, D) -> (Dp, Dp), exact
            return jnp.pad(w, ((0, Dp - D), (0, Dp - D)))

        if collapse:
            kp["cross_w"] = jnp.stack(
                [pad_dd(u.T @ v.T) for (u, v, _) in params["cross"]]).astype(mxu_dtype)
        else:
            kp["cross_u"] = jnp.stack(
                [jnp.pad(u.T, ((0, Dp - D), (0, Rp - R)))
                 for (u, _, _) in params["cross"]]).astype(mxu_dtype)
            kp["cross_v"] = jnp.stack(
                [jnp.pad(v.T, ((0, Rp - R), (0, Dp - D)))
                 for (_, v, _) in params["cross"]]).astype(mxu_dtype)
        kp["cross_b"] = jnp.stack(
            [jnp.pad(b, (0, Dp - D)).reshape(1, Dp)
             for (_, _, b) in params["cross"]]).astype(jnp.float32)
    else:
        kp["collapse_cross"] = True

    deep, deep_out_pad = [], []
    k_in, k_in_pad = D, Dp
    for (w, b) in params["deep"]:
        n_out = w.shape[0]
        n_out_pad = _round_up(n_out, lane_multiple)
        wt = jnp.pad(w.T, ((0, k_in_pad - k_in), (0, n_out_pad - n_out)))
        bp = jnp.pad(b, (0, n_out_pad - n_out)).reshape(1, n_out_pad)
        deep.append((wt.astype(mxu_dtype), bp.astype(jnp.float32)))
        deep_out_pad.append(n_out_pad)
        k_in, k_in_pad = n_out, n_out_pad
    kp["deep"] = deep
    kp["deep_out_pad"] = deep_out_pad

    h_last = params["deep"][-1][0].shape[0]
    h_last_pad = deep_out_pad[-1]
    out_w = params["out_w"]
    assert out_w.shape[1] == D + h_last, "output head expects [xl | deep] columns"
    kp["head_w_xl"] = jnp.pad(out_w[:, :D],
                              ((0, 0), (0, Dp - D))).astype(jnp.float32)
    kp["head_w_deep"] = jnp.pad(out_w[:, D:],
                                ((0, 0), (0, h_last_pad - h_last))).astype(jnp.float32)
    kp["head_b"] = params["out_b"].reshape(1).astype(jnp.float32)
    return kp


# ------------------------------ fused wrapper -------------------------------- #

def dcnv2_fused(kp, x, *, tile_b=None, stream_x_bf16=False):
    """x: (B, D) f32 feature matrix -> (B,) sigmoid scores."""
    B, D = x.shape
    assert D == kp["d_in"], (D, kp["d_in"])
    Dp = kp["d_in_pad"]
    gen = kp["generation"]
    cap = kp["vmem_cap"]
    n_cross = kp["n_cross"]
    n_deep = len(kp["deep"])
    collapse = kp["collapse_cross"]
    mxu_dtype = kp["mxu_dtype"]

    # Grid-invariant weight inputs, in kernel-argument order.
    weight_arrays = []
    if n_cross > 0:
        if collapse:
            weight_arrays.append(kp["cross_w"])
        else:
            weight_arrays += [kp["cross_u"], kp["cross_v"]]
        weight_arrays.append(kp["cross_b"])
    for (wt, b) in kp["deep"]:
        weight_arrays += [wt, b]
    weight_arrays += [kp["head_w_xl"], kp["head_w_deep"]]
    weight_bytes = sum(int(a.size * a.dtype.itemsize) for a in weight_arrays)

    # ---- batch-tile selection (largest TB that fits the per-gen VMEM cap) ----
    B8 = _round_up(B, 8)
    x_item = 2 if stream_x_bf16 else 4
    max_act = max([Dp] + kp["deep_out_pad"])

    def vmem_est(tb):
        return (2 * tb * Dp * x_item        # double-buffered x tile
                + 4 * tb * 4                # output tiles
                + 8 * tb * max_act * 4      # live f32/bf16 intermediates (slack)
                + 2 * weight_bytes          # conservative (double-buffered weights)
                + (4 << 20))                # misc headroom

    if tile_b is not None:
        TB = min(_round_up(max(int(tile_b), 8), 8), B8)
    else:
        max_tb = 1024 if gen >= 7 else 2048
        if gen >= 7 and B8 >= 16:           # keep >=2 tiles so both v7x TCs work
            max_tb = max(8, min(max_tb, (B8 // 2) // 8 * 8))
        TB = 8
        for cand in (2048, 1024, 512, 256, 128, 64, 32, 16, 8):
            if cand <= min(max_tb, B8) and vmem_est(cand) <= cap:
                TB = cand
                break
    Bp = _round_up(B8, TB)
    n_tiles = Bp // TB

    xp = x
    if (Bp - B) or (Dp - D):
        xp = jnp.pad(xp, ((0, Bp - B), (0, Dp - D)))
    if stream_x_bf16:
        xp = xp.astype(jnp.bfloat16)        # halves per-tile HBM traffic (v5e)

    lane_ok = (TB % 128 == 0) or (TB == Bp)
    vmem_limit = int(cap)

    def _attempt(single_buffer_weights, lane_dense_out, hb_smem):
        def full(a):
            nd = a.ndim
            if single_buffer_weights:
                # constant index map -> fetched once; 1 buffer halves weight VMEM
                return pl.BlockSpec(a.shape, lambda i, _nd=nd: (0,) * _nd,
                                    pipeline_mode=pl.Buffered(1))
            return pl.BlockSpec(a.shape, lambda i, _nd=nd: (0,) * _nd)

        in_specs = [pl.BlockSpec((TB, Dp), lambda i: (i, 0))]
        in_specs += [full(a) for a in weight_arrays]
        if hb_smem:
            hb_in = kp["head_b"]                                     # (1,) f32
            in_specs.append(pl.BlockSpec(memory_space=pltpu.MemorySpace.SMEM))
        else:
            hb_in = kp["head_b"].reshape(1, 1)
            in_specs.append(full(hb_in))
        inputs = [xp] + weight_arrays + [hb_in]

        if lane_dense_out:
            out_shape = jax.ShapeDtypeStruct((1, Bp), jnp.float32)   # batch on lanes
            out_specs = pl.BlockSpec((1, TB), lambda i: (0, i))
        else:
            out_shape = jax.ShapeDtypeStruct((Bp, 1), jnp.float32)
            out_specs = pl.BlockSpec((TB, 1), lambda i: (i, 0))

        kernel = _make_fused_kernel(n_cross, n_deep, collapse, mxu_dtype,
                                    lane_dense_out, hb_smem)
        out = pl.pallas_call(
            kernel,
            out_shape=out_shape,
            grid=(n_tiles,),
            in_specs=in_specs,
            out_specs=out_specs,
            compiler_params=pltpu.CompilerParams(
                dimension_semantics=("parallel",),   # shard batch tiles across TCs
                vmem_limit_bytes=vmem_limit),
        )(*inputs)
        out = jax.block_until_ready(out)
        return out[0, :B] if lane_dense_out else out[:B, 0]

    # Aggressive config first; fall back to conservative ones if lowering rejects.
    attempts = [(True, lane_ok, True),     # single-buffered weights, lane-dense out
                (False, False, True),      # default buffering, column out
                (False, False, False)]     # fully conservative (previous layout)
    last_err = None
    for cfg in attempts:
        try:
            return _attempt(*cfg)
        except Exception as e:  # noqa: BLE001 - retry with a safer configuration
            last_err = e
    raise last_err


# ------------------------------ Model (params) ------------------------------ #

def init_params(key, num_numerical, cat_cardinalities, embedding_dim,
                cross_layers, cross_rank, deep_layers, onehot_size):
    input_dim = num_numerical + len(cat_cardinalities) * embedding_dim + onehot_size
    params = {"emb": [], "cross": [], "deep": []}

    for card in cat_cardinalities:
        key, k = jax.random.split(key)
        params["emb"].append(
            jax.random.normal(k, (card + 1, embedding_dim), jnp.float32) * 0.05)

    for _ in range(cross_layers):
        key, k1, k2 = jax.random.split(key, 3)
        u_w = jax.random.normal(k1, (cross_rank, input_dim), jnp.float32) * 0.05
        v_w = jax.random.normal(k2, (input_dim, cross_rank), jnp.float32) * 0.05
        bias = jnp.zeros((input_dim,), jnp.float32)
        params["cross"].append((u_w, v_w, bias))

    dims = [input_dim] + list(deep_layers)
    for i in range(len(deep_layers)):
        key, k1, k2 = jax.random.split(key, 3)
        w = jax.random.normal(k1, (dims[i + 1], dims[i]), jnp.float32) * 0.05
        b = jax.random.normal(k2, (dims[i + 1],), jnp.float32) * 0.01
        params["deep"].append((w, b))

    key, k1, k2 = jax.random.split(key, 3)
    params["out_w"] = jax.random.normal(
        k1, (1, input_dim + deep_layers[-1]), jnp.float32) * 0.05
    params["out_b"] = jax.random.normal(k2, (1,), jnp.float32) * 0.01
    return params


def dcnv2_forward(params, kparams, numerical, categorical_emb, categorical_onehot,
                  *, tile_b=None, stream_x_bf16=False):
    # embedding lookups + feature concat (data-dependent gather: plain-JAX glue)
    cat_embeds = [jnp.take(tbl, categorical_emb[:, i], axis=0)
                  for i, tbl in enumerate(params["emb"])]
    x = jnp.concatenate([numerical] + cat_embeds + [categorical_onehot], axis=1)
    x = x.astype(jnp.float32)
    # fused cross + deep + head (single Pallas kernel)
    return dcnv2_fused(kparams, x, tile_b=tile_b, stream_x_bf16=stream_x_bf16)


# --------------------------- pure-JAX reference ----------------------------- #

def dcnv2_reference(params, numerical, categorical_emb, categorical_onehot):
    cat_embeds = [jnp.take(tbl, categorical_emb[:, i], axis=0)
                  for i, tbl in enumerate(params["emb"])]
    x = jnp.concatenate([numerical] + cat_embeds + [categorical_onehot], axis=1)
    x = x.astype(jnp.float32)
    x0, xl = x, x
    for (u_w, v_w, bias) in params["cross"]:
        xl = x0 * ((xl @ u_w.T) @ v_w.T) + bias + xl
    deep_x = x
    for (w, b) in params["deep"]:
        deep_x = jnp.maximum(deep_x @ w.T + b, 0.0)
    combined = jnp.concatenate([xl, deep_x], axis=1)
    return jax.nn.sigmoid(combined @ params["out_w"].T + params["out_b"])[:, 0]


# ----------------------------------- main ----------------------------------- #

if __name__ == "__main__":
    # small, self-consistent config
    batch = 8
    num_numerical = 3
    cat_cardinalities = [10, 20]
    embedding_dim = 4
    cross_layers = 2
    cross_rank = 8
    deep_layers = [32, 16]
    onehot_size = 5

    key = jax.random.PRNGKey(0)
    key, kp_key, kn, kc, ko = jax.random.split(key, 5)

    params = init_params(kp_key, num_numerical, cat_cardinalities, embedding_dim,
                         cross_layers, cross_rank, deep_layers, onehot_size)
    # One-time weight prep: pad to lane multiples, pre-transpose, collapse U^T V^T
    # per MXU-tile math, pre-cast MXU operands.
    kparams = prepare_kernel_params(params, mxu_dtype=jnp.bfloat16)

    numerical = jax.random.normal(kn, (batch, num_numerical), jnp.float32)
    categorical_emb = jnp.stack(
        [jax.random.randint(jax.random.fold_in(kc, i), (batch,), 0, card + 1)
         for i, card in enumerate(cat_cardinalities)], axis=1).astype(jnp.int32)
    categorical_onehot = (
        jax.nn.one_hot(jax.random.randint(ko, (batch,), 0, onehot_size),
                       onehot_size).astype(jnp.float32))

    out = dcnv2_forward(params, kparams, numerical, categorical_emb,
                        categorical_onehot)
    out = jax.block_until_ready(out)

    ref = dcnv2_reference(params, numerical, categorical_emb, categorical_onehot)
    assert out.shape == (batch,)
    # bf16 MXU operands -> compare against the f32 reference with a loosened
    # tolerance (error ~ sqrt(D)*eps_bf16 in the K=D contraction; D is small here).
    assert jnp.allclose(out, ref, atol=2e-2, rtol=0.0), (out, ref)

    print("KERNEL_OK")
</pallas_src>

<mosaic_0001>
module attributes {stable_mosaic.version = 11 : i64} {
  func.func @kernel(%arg0: i32, %arg1: memref<8x128xf32, #tpu.memory_space<vmem>>, %arg2: memref<2x128x128xbf16, #tpu.memory_space<vmem>>, %arg3: memref<2x1x128xf32, #tpu.memory_space<vmem>>, %arg4: memref<128x128xbf16, #tpu.memory_space<vmem>>, %arg5: memref<1x128xf32, #tpu.memory_space<vmem>>, %arg6: memref<128x128xbf16, #tpu.memory_space<vmem>>, %arg7: memref<1x128xf32, #tpu.memory_space<vmem>>, %arg8: memref<1x128xf32, #tpu.memory_space<vmem>>, %arg9: memref<1x128xf32, #tpu.memory_space<vmem>>, %arg10: memref<1xf32, #tpu.memory_space<smem>>, %arg11: memref<1x8xf32, #tpu.memory_space<vmem>>) attributes {dimension_semantics = [#tpu.dimension_semantics<parallel>], iteration_bounds = array<i64: 1>, scalar_prefetch = 0 : i64, scratch_operands = 0 : i64, tpu.core_type = #tpu.core_type<tc>, window_params = [{transform_indices = @transform_0, window_bounds = array<i64: 8, 128>}, {pipeline_mode = #tpu.pipeline_mode<synchronous>, transform_indices = @transform_1, window_bounds = array<i64: 2, 128, 128>}, {pipeline_mode = #tpu.pipeline_mode<synchronous>, transform_indices = @transform_2, window_bounds = array<i64: 2, 1, 128>}, {pipeline_mode = #tpu.pipeline_mode<synchronous>, transform_indices = @transform_3, window_bounds = array<i64: 128, 128>}, {pipeline_mode = #tpu.pipeline_mode<synchronous>, transform_indices = @transform_4, window_bounds = array<i64: 1, 128>}, {pipeline_mode = #tpu.pipeline_mode<synchronous>, transform_indices = @transform_5, window_bounds = array<i64: 128, 128>}, {pipeline_mode = #tpu.pipeline_mode<synchronous>, transform_indices = @transform_6, window_bounds = array<i64: 1, 128>}, {pipeline_mode = #tpu.pipeline_mode<synchronous>, transform_indices = @transform_7, window_bounds = array<i64: 1, 128>}, {pipeline_mode = #tpu.pipeline_mode<synchronous>, transform_indices = @transform_8, window_bounds = array<i64: 1, 128>}, {transform_indices = @transform_9, window_bounds = array<i64: 1>}, {transform_indices = @transform_10, window_bounds = array<i64: 1, 8>}]} {
    %c0 = arith.constant 0 : index
    %c0_0 = arith.constant 0 : index
    %0 = vector.load %arg1[%c0, %c0_0] : memref<8x128xf32, #tpu.memory_space<vmem>>, vector<8x128xf32>
    %1 = arith.truncf %0 : vector<8x128xf32> to vector<8x128xbf16>
    %c0_1 = arith.constant 0 : index
    %c0_2 = arith.constant 0 : index
    %c0_3 = arith.constant 0 : index
    %2 = vector.load %arg2[%c0_1, %c0_2, %c0_3] : memref<2x128x128xbf16, #tpu.memory_space<vmem>>, vector<1x128x128xbf16>
    %3 = vector.shape_cast %2 : vector<1x128x128xbf16> to vector<128x128xbf16>
    %cst = arith.constant dense<0.000000e+00> : vector<8x128xf32>
    %4 = tpu.matmul %1, %3, %cst {dimension_numbers = #tpu.dot_dimension_numbers<[1], [0], [0], [1], [0, 0, 1, 1], [], []>} : vector<8x128xbf16>, vector<128x128xbf16>, vector<8x128xf32> -> vector<8x128xf32>
    %5 = arith.mulf %0, %4 : vector<8x128xf32>
    %c0_4 = arith.constant 0 : index
    %c0_5 = arith.constant 0 : index
    %c0_6 = arith.constant 0 : index
    %6 = vector.load %arg3[%c0_4, %c0_5, %c0_6] : memref<2x1x128xf32, #tpu.memory_space<vmem>>, vector<1x1x128xf32>
    %7 = vector.shape_cast %6 : vector<1x1x128xf32> to vector<1x128xf32>
    %8 = vector.broadcast %7 : vector<1x128xf32> to vector<8x128xf32>
    %9 = arith.addf %5, %8 : vector<8x128xf32>
    %10 = arith.addf %9, %0 : vector<8x128xf32>
    %11 = arith.truncf %10 : vector<8x128xf32> to vector<8x128xbf16>
    %c1 = arith.constant 1 : index
    %c0_7 = arith.constant 0 : index
    %c0_8 = arith.constant 0 : index
    %12 = vector.load %arg2[%c1, %c0_7, %c0_8] : memref<2x128x128xbf16, #tpu.memory_space<vmem>>, vector<1x128x128xbf16>
    %13 = vector.shape_cast %12 : vector<1x128x128xbf16> to vector<128x128xbf16>
    %cst_9 = arith.constant dense<0.000000e+00> : vector<8x128xf32>
    %14 = tpu.matmul %11, %13, %cst_9 {dimension_numbers = #tpu.dot_dimension_numbers<[1], [0], [0], [1], [0, 0, 1, 1], [], []>} : vector<8x128xbf16>, vector<128x128xbf16>, vector<8x128xf32> -> vector<8x128xf32>
    %15 = arith.mulf %0, %14 : vector<8x128xf32>
    %c1_10 = arith.constant 1 : index
    %c0_11 = arith.constant 0 : index
    %c0_12 = arith.constant 0 : index
    %16 = vector.load %arg3[%c1_10, %c0_11, %c0_12] : memref<2x1x128xf32, #tpu.memory_space<vmem>>, vector<1x1x128xf32>
    %17 = vector.shape_cast %16 : vector<1x1x128xf32> to vector<1x128xf32>
    %18 = vector.broadcast %17 : vector<1x128xf32> to vector<8x128xf32>
    %19 = arith.addf %15, %18 : vector<8x128xf32>
    %20 = arith.addf %19, %10 : vector<8x128xf32>
    %21 = arith.truncf %0 : vector<8x128xf32> to vector<8x128xbf16>
    %c0_13 = arith.constant 0 : index
    %c0_14 = arith.constant 0 : index
    %22 = vector.load %arg4[%c0_13, %c0_14] : memref<128x128xbf16, #tpu.memory_space<vmem>>, vector<128x128xbf16>
    %cst_15 = arith.constant dense<0.000000e+00> : vector<8x128xf32>
    %23 = tpu.matmul %21, %22, %cst_15 {dimension_numbers = #tpu.dot_dimension_numbers<[1], [0], [0], [1], [0, 0, 1, 1], [], []>} : vector<8x128xbf16>, vector<128x128xbf16>, vector<8x128xf32> -> vector<8x128xf32>
    %c0_16 = arith.constant 0 : index
    %c0_17 = arith.constant 0 : index
    %24 = vector.load %arg5[%c0_16, %c0_17] : memref<1x128xf32, #tpu.memory_space<vmem>>, vector<1x128xf32>
    %25 = vector.broadcast %24 : vector<1x128xf32> to vector<8x128xf32>
    %26 = arith.addf %23, %25 : vector<8x128xf32>
    %cst_18 = arith.constant 0.000000e+00 : f32
    %27 = vector.broadcast %cst_18 : f32 to vector<8x128xf32>
    %28 = arith.maximumf %26, %27 : vector<8x128xf32>
    %29 = arith.truncf %28 : vector<8x128xf32> to vector<8x128xbf16>
    %c0_19 = arith.constant 0 : index
    %c0_20 = arith.constant 0 : index
    %30 = vector.load %arg6[%c0_19, %c0_20] : memref<128x128xbf16, #tpu.memory_space<vmem>>, vector<128x128xbf16>
    %cst_21 = arith.constant dense<0.000000e+00> : vector<8x128xf32>
    %31 = tpu.matmul %29, %30, %cst_21 {dimension_numbers = #tpu.dot_dimension_numbers<[1], [0], [0], [1], [0, 0, 1, 1], [], []>} : vector<8x128xbf16>, vector<128x128xbf16>, vector<8x128xf32> -> vector<8x128xf32>
    %c0_22 = arith.constant 0 : index
    %c0_23 = arith.constant 0 : index
    %32 = vector.load %arg7[%c0_22, %c0_23] : memref<1x128xf32, #tpu.memory_space<vmem>>, vector<1x128xf32>
    %33 = vector.broadcast %32 : vector<1x128xf32> to vector<8x128xf32>
    %34 = arith.addf %31, %33 : vector<8x128xf32>
    %cst_24 = arith.constant 0.000000e+00 : f32
    %35 = vector.broadcast %cst_24 : f32 to vector<8x128xf32>
    %36 = arith.maximumf %34, %35 : vector<8x128xf32>
    %c0_25 = arith.constant 0 : index
    %37 = memref.load %arg10[%c0_25] : memref<1xf32, #tpu.memory_space<smem>>
    %c0_26 = arith.constant 0 : index
    %c0_27 = arith.constant 0 : index
    %38 = vector.load %arg8[%c0_26, %c0_27] : memref<1x128xf32, #tpu.memory_space<vmem>>, vector<1x128xf32>
    %39 = vector.broadcast %38 : vector<1x128xf32> to vector<8x128xf32>
    %40 = arith.mulf %20, %39 : vector<8x128xf32>
    %cst_28 = arith.constant dense<0.000000e+00> : vector<8xf32>
    %41 = vector.multi_reduction <add>, %40, %cst_28 [1] : vector<8x128xf32> to vector<8xf32>
    %42 = vector.shape_cast %41 : vector<8xf32> to vector<8x1xf32>
    %c0_29 = arith.constant 0 : index
    %c0_30 = arith.constant 0 : index
    %43 = vector.load %arg9[%c0_29, %c0_30] : memref<1x128xf32, #tpu.memory_space<vmem>>, vector<1x128xf32>
    %44 = vector.broadcast %43 : vector<1x128xf32> to vector<8x128xf32>
    %45 = arith.mulf %36, %44 : vector<8x128xf32>
    %cst_31 = arith.constant dense<0.000000e+00> : vector<8xf32>
    %46 = vector.multi_reduction <add>, %45, %cst_31 [1] : vector<8x128xf32> to vector<8xf32>
    %47 = vector.shape_cast %46 : vector<8xf32> to vector<8x1xf32>
    %48 = arith.addf %42, %47 : vector<8x1xf32>
    %49 = vector.broadcast %37 : f32 to vector<8x1xf32>
    %50 = arith.addf %48, %49 : vector<8x1xf32>
    %51 = arith.negf %50 : vector<8x1xf32>
    %52 = math.exp %51 : vector<8x1xf32>
    %cst_32 = arith.constant 1.000000e+00 : f32
    %53 = vector.broadcast %cst_32 : f32 to vector<8x1xf32>
    %54 = arith.addf %53, %52 : vector<8x1xf32>
    %55 = arith.divf %53, %54 : vector<8x1xf32>
    %56 = vector.shape_cast %55 : vector<8x1xf32> to vector<1x8xf32>
    %c0_33 = arith.constant 0 : index
    %c0_34 = arith.constant 0 : index
    %57 = vector.load %arg11[%c0_33, %c0_34] : memref<1x8xf32, #tpu.memory_space<vmem>>, vector<1x8xf32>
    tpu.vector_store %arg11[%c0_33, %c0_34], %56 {strides = array<i32>} : memref<1x8xf32, #tpu.memory_space<vmem>>, vector<1x8xf32>,
    return
  }
  func.func @transform_0(%arg0: i32) -> (i32, i32) {
    %c0_i32 = arith.constant 0 : i32
    %c0_i32_0 = arith.constant 0 : i32
    return %arg0, %c0_i32 : i32, i32
  }
  func.func @transform_1(%arg0: i32) -> (i32, i32, i32) {
    %c0_i32 = arith.constant 0 : i32
    %c0_i32_0 = arith.constant 0 : i32
    %c0_i32_1 = arith.constant 0 : i32
    %c0_i32_2 = arith.constant 0 : i32
    return %c0_i32, %c0_i32_0, %c0_i32_1 : i32, i32, i32
  }
  func.func @transform_2(%arg0: i32) -> (i32, i32, i32) {
    %c0_i32 = arith.constant 0 : i32
    %c0_i32_0 = arith.constant 0 : i32
    %c0_i32_1 = arith.constant 0 : i32
    %c0_i32_2 = arith.constant 0 : i32
    return %c0_i32, %c0_i32_0, %c0_i32_1 : i32, i32, i32
  }
  func.func @transform_3(%arg0: i32) -> (i32, i32) {
    %c0_i32 = arith.constant 0 : i32
    %c0_i32_0 = arith.constant 0 : i32
    %c0_i32_1 = arith.constant 0 : i32
    return %c0_i32, %c0_i32_0 : i32, i32
  }
  func.func @transform_4(%arg0: i32) -> (i32, i32) {
    %c0_i32 = arith.constant 0 : i32
    %c0_i32_0 = arith.constant 0 : i32
    %c0_i32_1 = arith.constant 0 : i32
    return %c0_i32, %c0_i32_0 : i32, i32
  }
  func.func @transform_5(%arg0: i32) -> (i32, i32) {
    %c0_i32 = arith.constant 0 : i32
    %c0_i32_0 = arith.constant 0 : i32
    %c0_i32_1 = arith.constant 0 : i32
    return %c0_i32, %c0_i32_0 : i32, i32
  }
  func.func @transform_6(%arg0: i32) -> (i32, i32) {
    %c0_i32 = arith.constant 0 : i32
    %c0_i32_0 = arith.constant 0 : i32
    %c0_i32_1 = arith.constant 0 : i32
    return %c0_i32, %c0_i32_0 : i32, i32
  }
  func.func @transform_7(%arg0: i32) -> (i32, i32) {
    %c0_i32 = arith.constant 0 : i32
    %c0_i32_0 = arith.constant 0 : i32
    %c0_i32_1 = arith.constant 0 : i32
    return %c0_i32, %c0_i32_0 : i32, i32
  }
  func.func @transform_8(%arg0: i32) -> (i32, i32) {
    %c0_i32 = arith.constant 0 : i32
    %c0_i32_0 = arith.constant 0 : i32
    %c0_i32_1 = arith.constant 0 : i32
    return %c0_i32, %c0_i32_0 : i32, i32
  }
  func.func @transform_9(%arg0: i32) -> i32 {
    %c0_i32 = arith.constant 0 : i32
    %c0_i32_0 = arith.constant 0 : i32
    return %c0_i32 : i32
  }
  func.func @transform_10(%arg0: i32) -> (i32, i32) {
    %c0_i32 = arith.constant 0 : i32
    %c0_i32_0 = arith.constant 0 : i32
    return %c0_i32, %arg0 : i32, i32
  }
}

module attributes {stable_mosaic.version = 11 : i64} {
  func.func @kernel(%arg0: i32, %arg1: memref<8x128xf32, #tpu.memory_space<vmem>>, %arg2: memref<2x128x128xbf16, #tpu.memory_space<vmem>>, %arg3: memref<2x1x128xf32, #tpu.memory_space<vmem>>, %arg4: memref<128x128xbf16, #tpu.memory_space<vmem>>, %arg5: memref<1x128xf32, #tpu.memory_space<vmem>>, %arg6: memref<128x128xbf16, #tpu.memory_space<vmem>>, %arg7: memref<1x128xf32, #tpu.memory_space<vmem>>, %arg8: memref<1x128xf32, #tpu.memory_space<vmem>>, %arg9: memref<1x128xf32, #tpu.memory_space<vmem>>, %arg10: memref<1xf32, #tpu.memory_space<smem>>, %arg11: memref<8x1xf32, #tpu.memory_space<vmem>>) attributes {dimension_semantics = [#tpu.dimension_semantics<parallel>], iteration_bounds = array<i64: 1>, scalar_prefetch = 0 : i64, scratch_operands = 0 : i64, tpu.core_type = #tpu.core_type<tc>, window_params = [{transform_indices = @transform_0, window_bounds = array<i64: 8, 128>}, {pipeline_mode = #tpu.pipeline_mode<synchronous>, transform_indices = @transform_1, window_bounds = array<i64: 2, 128, 128>}, {pipeline_mode = #tpu.pipeline_mode<synchronous>, transform_indices = @transform_2, window_bounds = array<i64: 2, 1, 128>}, {pipeline_mode = #tpu.pipeline_mode<synchronous>, transform_indices = @transform_3, window_bounds = array<i64: 128, 128>}, {pipeline_mode = #tpu.pipeline_mode<synchronous>, transform_indices = @transform_4, window_bounds = array<i64: 1, 128>}, {pipeline_mode = #tpu.pipeline_mode<synchronous>, transform_indices = @transform_5, window_bounds = array<i64: 128, 128>}, {pipeline_mode = #tpu.pipeline_mode<synchronous>, transform_indices = @transform_6, window_bounds = array<i64: 1, 128>}, {pipeline_mode = #tpu.pipeline_mode<synchronous>, transform_indices = @transform_7, window_bounds = array<i64: 1, 128>}, {pipeline_mode = #tpu.pipeline_mode<synchronous>, transform_indices = @transform_8, window_bounds = array<i64: 1, 128>}, {transform_indices = @transform_9, window_bounds = array<i64: 1>}, {transform_indices = @transform_10, window_bounds = array<i64: 8, 1>}]} {
    %c0 = arith.constant 0 : index
    %c0_0 = arith.constant 0 : index
    %0 = vector.load %arg1[%c0, %c0_0] : memref<8x128xf32, #tpu.memory_space<vmem>>, vector<8x128xf32>
    %1 = arith.truncf %0 : vector<8x128xf32> to vector<8x128xbf16>
    %c0_1 = arith.constant 0 : index
    %c0_2 = arith.constant 0 : index
    %c0_3 = arith.constant 0 : index
    %2 = vector.load %arg2[%c0_1, %c0_2, %c0_3] : memref<2x128x128xbf16, #tpu.memory_space<vmem>>, vector<1x128x128xbf16>
    %3 = vector.shape_cast %2 : vector<1x128x128xbf16> to vector<128x128xbf16>
    %cst = arith.constant dense<0.000000e+00> : vector<8x128xf32>
    %4 = tpu.matmul %1, %3, %cst {dimension_numbers = #tpu.dot_dimension_numbers<[1], [0], [0], [1], [0, 0, 1, 1], [], []>} : vector<8x128xbf16>, vector<128x128xbf16>, vector<8x128xf32> -> vector<8x128xf32>
    %5 = arith.mulf %0, %4 : vector<8x128xf32>
    %c0_4 = arith.constant 0 : index
    %c0_5 = arith.constant 0 : index
    %c0_6 = arith.constant 0 : index
    %6 = vector.load %arg3[%c0_4, %c0_5, %c0_6] : memref<2x1x128xf32, #tpu.memory_space<vmem>>, vector<1x1x128xf32>
    %7 = vector.shape_cast %6 : vector<1x1x128xf32> to vector<1x128xf32>
    %8 = vector.broadcast %7 : vector<1x128xf32> to vector<8x128xf32>
    %9 = arith.addf %5, %8 : vector<8x128xf32>
    %10 = arith.addf %9, %0 : vector<8x128xf32>
    %11 = arith.truncf %10 : vector<8x128xf32> to vector<8x128xbf16>
    %c1 = arith.constant 1 : index
    %c0_7 = arith.constant 0 : index
    %c0_8 = arith.constant 0 : index
    %12 = vector.load %arg2[%c1, %c0_7, %c0_8] : memref<2x128x128xbf16, #tpu.memory_space<vmem>>, vector<1x128x128xbf16>
    %13 = vector.shape_cast %12 : vector<1x128x128xbf16> to vector<128x128xbf16>
    %cst_9 = arith.constant dense<0.000000e+00> : vector<8x128xf32>
    %14 = tpu.matmul %11, %13, %cst_9 {dimension_numbers = #tpu.dot_dimension_numbers<[1], [0], [0], [1], [0, 0, 1, 1], [], []>} : vector<8x128xbf16>, vector<128x128xbf16>, vector<8x128xf32> -> vector<8x128xf32>
    %15 = arith.mulf %0, %14 : vector<8x128xf32>
    %c1_10 = arith.constant 1 : index
    %c0_11 = arith.constant 0 : index
    %c0_12 = arith.constant 0 : index
    %16 = vector.load %arg3[%c1_10, %c0_11, %c0_12] : memref<2x1x128xf32, #tpu.memory_space<vmem>>, vector<1x1x128xf32>
    %17 = vector.shape_cast %16 : vector<1x1x128xf32> to vector<1x128xf32>
    %18 = vector.broadcast %17 : vector<1x128xf32> to vector<8x128xf32>
    %19 = arith.addf %15, %18 : vector<8x128xf32>
    %20 = arith.addf %19, %10 : vector<8x128xf32>
    %21 = arith.truncf %0 : vector<8x128xf32> to vector<8x128xbf16>
    %c0_13 = arith.constant 0 : index
    %c0_14 = arith.constant 0 : index
    %22 = vector.load %arg4[%c0_13, %c0_14] : memref<128x128xbf16, #tpu.memory_space<vmem>>, vector<128x128xbf16>
    %cst_15 = arith.constant dense<0.000000e+00> : vector<8x128xf32>
    %23 = tpu.matmul %21, %22, %cst_15 {dimension_numbers = #tpu.dot_dimension_numbers<[1], [0], [0], [1], [0, 0, 1, 1], [], []>} : vector<8x128xbf16>, vector<128x128xbf16>, vector<8x128xf32> -> vector<8x128xf32>
    %c0_16 = arith.constant 0 : index
    %c0_17 = arith.constant 0 : index
    %24 = vector.load %arg5[%c0_16, %c0_17] : memref<1x128xf32, #tpu.memory_space<vmem>>, vector<1x128xf32>
    %25 = vector.broadcast %24 : vector<1x128xf32> to vector<8x128xf32>
    %26 = arith.addf %23, %25 : vector<8x128xf32>
    %cst_18 = arith.constant 0.000000e+00 : f32
    %27 = vector.broadcast %cst_18 : f32 to vector<8x128xf32>
    %28 = arith.maximumf %26, %27 : vector<8x128xf32>
    %29 = arith.truncf %28 : vector<8x128xf32> to vector<8x128xbf16>
    %c0_19 = arith.constant 0 : index
    %c0_20 = arith.constant 0 : index
    %30 = vector.load %arg6[%c0_19, %c0_20] : memref<128x128xbf16, #tpu.memory_space<vmem>>, vector<128x128xbf16>
    %cst_21 = arith.constant dense<0.000000e+00> : vector<8x128xf32>
    %31 = tpu.matmul %29, %30, %cst_21 {dimension_numbers = #tpu.dot_dimension_numbers<[1], [0], [0], [1], [0, 0, 1, 1], [], []>} : vector<8x128xbf16>, vector<128x128xbf16>, vector<8x128xf32> -> vector<8x128xf32>
    %c0_22 = arith.constant 0 : index
    %c0_23 = arith.constant 0 : index
    %32 = vector.load %arg7[%c0_22, %c0_23] : memref<1x128xf32, #tpu.memory_space<vmem>>, vector<1x128xf32>
    %33 = vector.broadcast %32 : vector<1x128xf32> to vector<8x128xf32>
    %34 = arith.addf %31, %33 : vector<8x128xf32>
    %cst_24 = arith.constant 0.000000e+00 : f32
    %35 = vector.broadcast %cst_24 : f32 to vector<8x128xf32>
    %36 = arith.maximumf %34, %35 : vector<8x128xf32>
    %c0_25 = arith.constant 0 : index
    %37 = memref.load %arg10[%c0_25] : memref<1xf32, #tpu.memory_space<smem>>
    %c0_26 = arith.constant 0 : index
    %c0_27 = arith.constant 0 : index
    %38 = vector.load %arg8[%c0_26, %c0_27] : memref<1x128xf32, #tpu.memory_space<vmem>>, vector<1x128xf32>
    %39 = vector.broadcast %38 : vector<1x128xf32> to vector<8x128xf32>
    %40 = arith.mulf %20, %39 : vector<8x128xf32>
    %cst_28 = arith.constant dense<0.000000e+00> : vector<8xf32>
    %41 = vector.multi_reduction <add>, %40, %cst_28 [1] : vector<8x128xf32> to vector<8xf32>
    %42 = vector.shape_cast %41 : vector<8xf32> to vector<8x1xf32>
    %c0_29 = arith.constant 0 : index
    %c0_30 = arith.constant 0 : index
    %43 = vector.load %arg9[%c0_29, %c0_30] : memref<1x128xf32, #tpu.memory_space<vmem>>, vector<1x128xf32>
    %44 = vector.broadcast %43 : vector<1x128xf32> to vector<8x128xf32>
    %45 = arith.mulf %36, %44 : vector<8x128xf32>
    %cst_31 = arith.constant dense<0.000000e+00> : vector<8xf32>
    %46 = vector.multi_reduction <add>, %45, %cst_31 [1] : vector<8x128xf32> to vector<8xf32>
    %47 = vector.shape_cast %46 : vector<8xf32> to vector<8x1xf32>
    %48 = arith.addf %42, %47 : vector<8x1xf32>
    %49 = vector.broadcast %37 : f32 to vector<8x1xf32>
    %50 = arith.addf %48, %49 : vector<8x1xf32>
    %51 = arith.negf %50 : vector<8x1xf32>
    %52 = math.exp %51 : vector<8x1xf32>
    %cst_32 = arith.constant 1.000000e+00 : f32
    %53 = vector.broadcast %cst_32 : f32 to vector<8x1xf32>
    %54 = arith.addf %53, %52 : vector<8x1xf32>
    %55 = arith.divf %53, %54 : vector<8x1xf32>
    %c0_33 = arith.constant 0 : index
    %c0_34 = arith.constant 0 : index
    %56 = vector.load %arg11[%c0_33, %c0_34] : memref<8x1xf32, #tpu.memory_space<vmem>>, vector<8x1xf32>
    tpu.vector_store %arg11[%c0_33, %c0_34], %55 {strides = array<i32>} : memref<8x1xf32, #tpu.memory_space<vmem>>, vector<8x1xf32>,
    return
  }
  func.func @transform_0(%arg0: i32) -> (i32, i32) {
    %c0_i32 = arith.constant 0 : i32
    %c0_i32_0 = arith.constant 0 : i32
    return %arg0, %c0_i32 : i32, i32
  }
  func.func @transform_1(%arg0: i32) -> (i32, i32, i32) {
    %c0_i32 = arith.constant 0 : i32
    %c0_i32_0 = arith.constant 0 : i32
    %c0_i32_1 = arith.constant 0 : i32
    %c0_i32_2 = arith.constant 0 : i32
    return %c0_i32, %c0_i32_0, %c0_i32_1 : i32, i32, i32
  }
  func.func @transform_2(%arg0: i32) -> (i32, i32, i32) {
    %c0_i32 = arith.constant 0 : i32
    %c0_i32_0 = arith.constant 0 : i32
    %c0_i32_1 = arith.constant 0 : i32
    %c0_i32_2 = arith.constant 0 : i32
    return %c0_i32, %c0_i32_0, %c0_i32_1 : i32, i32, i32
  }
  func.func @transform_3(%arg0: i32) -> (i32, i32) {
    %c0_i32 = arith.constant 0 : i32
    %c0_i32_0 = arith.constant 0 : i32
    %c0_i32_1 = arith.constant 0 : i32
    return %c0_i32, %c0_i32_0 : i32, i32
  }
  func.func @transform_4(%arg0: i32) -> (i32, i32) {
    %c0_i32 = arith.constant 0 : i32
    %c0_i32_0 = arith.constant 0 : i32
    %c0_i32_1 = arith.constant 0 : i32
    return %c0_i32, %c0_i32_0 : i32, i32
  }
  func.func @transform_5(%arg0: i32) -> (i32, i32) {
    %c0_i32 = arith.constant 0 : i32
    %c0_i32_0 = arith.constant 0 : i32
    %c0_i32_1 = arith.constant 0 : i32
    return %c0_i32, %c0_i32_0 : i32, i32
  }
  func.func @transform_6(%arg0: i32) -> (i32, i32) {
    %c0_i32 = arith.constant 0 : i32
    %c0_i32_0 = arith.constant 0 : i32
    %c0_i32_1 = arith.constant 0 : i32
    return %c0_i32, %c0_i32_0 : i32, i32
  }
  func.func @transform_7(%arg0: i32) -> (i32, i32) {
    %c0_i32 = arith.constant 0 : i32
    %c0_i32_0 = arith.constant 0 : i32
    %c0_i32_1 = arith.constant 0 : i32
    return %c0_i32, %c0_i32_0 : i32, i32
  }
  func.func @transform_8(%arg0: i32) -> (i32, i32) {
    %c0_i32 = arith.constant 0 : i32
    %c0_i32_0 = arith.constant 0 : i32
    %c0_i32_1 = arith.constant 0 : i32
    return %c0_i32, %c0_i32_0 : i32, i32
  }
  func.func @transform_9(%arg0: i32) -> i32 {
    %c0_i32 = arith.constant 0 : i32
    %c0_i32_0 = arith.constant 0 : i32
    return %c0_i32 : i32
  }
  func.func @transform_10(%arg0: i32) -> (i32, i32) {
    %c0_i32 = arith.constant 0 : i32
    %c0_i32_0 = arith.constant 0 : i32
    return %arg0, %c0_i32 : i32, i32
  }
}

module attributes {stable_mosaic.version = 11 : i64} {
  func.func @kernel(%arg0: i32, %arg1: memref<8x128xf32, #tpu.memory_space<vmem>>, %arg2: memref<2x128x128xbf16, #tpu.memory_space<vmem>>, %arg3: memref<2x1x128xf32, #tpu.memory_space<vmem>>, %arg4: memref<128x128xbf16, #tpu.memory_space<vmem>>, %arg5: memref<1x128xf32, #tpu.memory_space<vmem>>, %arg6: memref<128x128xbf16, #tpu.memory_space<vmem>>, %arg7: memref<1x128xf32, #tpu.memory_space<vmem>>, %arg8: memref<1x128xf32, #tpu.memory_space<vmem>>, %arg9: memref<1x128xf32, #tpu.memory_space<vmem>>, %arg10: memref<1x1xf32, #tpu.memory_space<vmem>>, %arg11: memref<8x1xf32, #tpu.memory_space<vmem>>) attributes {dimension_semantics = [#tpu.dimension_semantics<parallel>], iteration_bounds = array<i64: 1>, scalar_prefetch = 0 : i64, scratch_operands = 0 : i64, tpu.core_type = #tpu.core_type<tc>, window_params = [{transform_indices = @transform_0, window_bounds = array<i64: 8, 128>}, {pipeline_mode = #tpu.pipeline_mode<synchronous>, transform_indices = @transform_1, window_bounds = array<i64: 2, 128, 128>}, {pipeline_mode = #tpu.pipeline_mode<synchronous>, transform_indices = @transform_2, window_bounds = array<i64: 2, 1, 128>}, {pipeline_mode = #tpu.pipeline_mode<synchronous>, transform_indices = @transform_3, window_bounds = array<i64: 128, 128>}, {pipeline_mode = #tpu.pipeline_mode<synchronous>, transform_indices = @transform_4, window_bounds = array<i64: 1, 128>}, {pipeline_mode = #tpu.pipeline_mode<synchronous>, transform_indices = @transform_5, window_bounds = array<i64: 128, 128>}, {pipeline_mode = #tpu.pipeline_mode<synchronous>, transform_indices = @transform_6, window_bounds = array<i64: 1, 128>}, {pipeline_mode = #tpu.pipeline_mode<synchronous>, transform_indices = @transform_7, window_bounds = array<i64: 1, 128>}, {pipeline_mode = #tpu.pipeline_mode<synchronous>, transform_indices = @transform_8, window_bounds = array<i64: 1, 128>}, {pipeline_mode = #tpu.pipeline_mode<synchronous>, transform_indices = @transform_9, window_bounds = array<i64: 1, 1>}, {transform_indices = @transform_10, window_bounds = array<i64: 8, 1>}]} {
    %c0 = arith.constant 0 : index
    %c0_0 = arith.constant 0 : index
    %0 = vector.load %arg1[%c0, %c0_0] : memref<8x128xf32, #tpu.memory_space<vmem>>, vector<8x128xf32>
    %1 = arith.truncf %0 : vector<8x128xf32> to vector<8x128xbf16>
    %c0_1 = arith.constant 0 : index
    %c0_2 = arith.constant 0 : index
    %c0_3 = arith.constant 0 : index
    %2 = vector.load %arg2[%c0_1, %c0_2, %c0_3] : memref<2x128x128xbf16, #tpu.memory_space<vmem>>, vector<1x128x128xbf16>
    %3 = vector.shape_cast %2 : vector<1x128x128xbf16> to vector<128x128xbf16>
    %cst = arith.constant dense<0.000000e+00> : vector<8x128xf32>
    %4 = tpu.matmul %1, %3, %cst {dimension_numbers = #tpu.dot_dimension_numbers<[1], [0], [0], [1], [0, 0, 1, 1], [], []>} : vector<8x128xbf16>, vector<128x128xbf16>, vector<8x128xf32> -> vector<8x128xf32>
    %5 = arith.mulf %0, %4 : vector<8x128xf32>
    %c0_4 = arith.constant 0 : index
    %c0_5 = arith.constant 0 : index
    %c0_6 = arith.constant 0 : index
    %6 = vector.load %arg3[%c0_4, %c0_5, %c0_6] : memref<2x1x128xf32, #tpu.memory_space<vmem>>, vector<1x1x128xf32>
    %7 = vector.shape_cast %6 : vector<1x1x128xf32> to vector<1x128xf32>
    %8 = vector.broadcast %7 : vector<1x128xf32> to vector<8x128xf32>
    %9 = arith.addf %5, %8 : vector<8x128xf32>
    %10 = arith.addf %9, %0 : vector<8x128xf32>
    %11 = arith.truncf %10 : vector<8x128xf32> to vector<8x128xbf16>
    %c1 = arith.constant 1 : index
    %c0_7 = arith.constant 0 : index
    %c0_8 = arith.constant 0 : index
    %12 = vector.load %arg2[%c1, %c0_7, %c0_8] : memref<2x128x128xbf16, #tpu.memory_space<vmem>>, vector<1x128x128xbf16>
    %13 = vector.shape_cast %12 : vector<1x128x128xbf16> to vector<128x128xbf16>
    %cst_9 = arith.constant dense<0.000000e+00> : vector<8x128xf32>
    %14 = tpu.matmul %11, %13, %cst_9 {dimension_numbers = #tpu.dot_dimension_numbers<[1], [0], [0], [1], [0, 0, 1, 1], [], []>} : vector<8x128xbf16>, vector<128x128xbf16>, vector<8x128xf32> -> vector<8x128xf32>
    %15 = arith.mulf %0, %14 : vector<8x128xf32>
    %c1_10 = arith.constant 1 : index
    %c0_11 = arith.constant 0 : index
    %c0_12 = arith.constant 0 : index
    %16 = vector.load %arg3[%c1_10, %c0_11, %c0_12] : memref<2x1x128xf32, #tpu.memory_space<vmem>>, vector<1x1x128xf32>
    %17 = vector.shape_cast %16 : vector<1x1x128xf32> to vector<1x128xf32>
    %18 = vector.broadcast %17 : vector<1x128xf32> to vector<8x128xf32>
    %19 = arith.addf %15, %18 : vector<8x128xf32>
    %20 = arith.addf %19, %10 : vector<8x128xf32>
    %21 = arith.truncf %0 : vector<8x128xf32> to vector<8x128xbf16>
    %c0_13 = arith.constant 0 : index
    %c0_14 = arith.constant 0 : index
    %22 = vector.load %arg4[%c0_13, %c0_14] : memref<128x128xbf16, #tpu.memory_space<vmem>>, vector<128x128xbf16>
    %cst_15 = arith.constant dense<0.000000e+00> : vector<8x128xf32>
    %23 = tpu.matmul %21, %22, %cst_15 {dimension_numbers = #tpu.dot_dimension_numbers<[1], [0], [0], [1], [0, 0, 1, 1], [], []>} : vector<8x128xbf16>, vector<128x128xbf16>, vector<8x128xf32> -> vector<8x128xf32>
    %c0_16 = arith.constant 0 : index
    %c0_17 = arith.constant 0 : index
    %24 = vector.load %arg5[%c0_16, %c0_17] : memref<1x128xf32, #tpu.memory_space<vmem>>, vector<1x128xf32>
    %25 = vector.broadcast %24 : vector<1x128xf32> to vector<8x128xf32>
    %26 = arith.addf %23, %25 : vector<8x128xf32>
    %cst_18 = arith.constant 0.000000e+00 : f32
    %27 = vector.broadcast %cst_18 : f32 to vector<8x128xf32>
    %28 = arith.maximumf %26, %27 : vector<8x128xf32>
    %29 = arith.truncf %28 : vector<8x128xf32> to vector<8x128xbf16>
    %c0_19 = arith.constant 0 : index
    %c0_20 = arith.constant 0 : index
    %30 = vector.load %arg6[%c0_19, %c0_20] : memref<128x128xbf16, #tpu.memory_space<vmem>>, vector<128x128xbf16>
    %cst_21 = arith.constant dense<0.000000e+00> : vector<8x128xf32>
    %31 = tpu.matmul %29, %30, %cst_21 {dimension_numbers = #tpu.dot_dimension_numbers<[1], [0], [0], [1], [0, 0, 1, 1], [], []>} : vector<8x128xbf16>, vector<128x128xbf16>, vector<8x128xf32> -> vector<8x128xf32>
    %c0_22 = arith.constant 0 : index
    %c0_23 = arith.constant 0 : index
    %32 = vector.load %arg7[%c0_22, %c0_23] : memref<1x128xf32, #tpu.memory_space<vmem>>, vector<1x128xf32>
    %33 = vector.broadcast %32 : vector<1x128xf32> to vector<8x128xf32>
    %34 = arith.addf %31, %33 : vector<8x128xf32>
    %cst_24 = arith.constant 0.000000e+00 : f32
    %35 = vector.broadcast %cst_24 : f32 to vector<8x128xf32>
    %36 = arith.maximumf %34, %35 : vector<8x128xf32>
    %c0_25 = arith.constant 0 : index
    %c0_26 = arith.constant 0 : index
    %37 = vector.load %arg10[%c0_25, %c0_26] : memref<1x1xf32, #tpu.memory_space<vmem>>, vector<1x1xf32>
    %38 = vector.extract %37[0, 0] : f32 from vector<1x1xf32>
    %c0_27 = arith.constant 0 : index
    %c0_28 = arith.constant 0 : index
    %39 = vector.load %arg8[%c0_27, %c0_28] : memref<1x128xf32, #tpu.memory_space<vmem>>, vector<1x128xf32>
    %40 = vector.broadcast %39 : vector<1x128xf32> to vector<8x128xf32>
    %41 = arith.mulf %20, %40 : vector<8x128xf32>
    %cst_29 = arith.constant dense<0.000000e+00> : vector<8xf32>
    %42 = vector.multi_reduction <add>, %41, %cst_29 [1] : vector<8x128xf32> to vector<8xf32>
    %43 = vector.shape_cast %42 : vector<8xf32> to vector<8x1xf32>
    %c0_30 = arith.constant 0 : index
    %c0_31 = arith.constant 0 : index
    %44 = vector.load %arg9[%c0_30, %c0_31] : memref<1x128xf32, #tpu.memory_space<vmem>>, vector<1x128xf32>
    %45 = vector.broadcast %44 : vector<1x128xf32> to vector<8x128xf32>
    %46 = arith.mulf %36, %45 : vector<8x128xf32>
    %cst_32 = arith.constant dense<0.000000e+00> : vector<8xf32>
    %47 = vector.multi_reduction <add>, %46, %cst_32 [1] : vector<8x128xf32> to vector<8xf32>
    %48 = vector.shape_cast %47 : vector<8xf32> to vector<8x1xf32>
    %49 = arith.addf %43, %48 : vector<8x1xf32>
    %50 = vector.broadcast %38 : f32 to vector<8x1xf32>
    %51 = arith.addf %49, %50 : vector<8x1xf32>
    %52 = arith.negf %51 : vector<8x1xf32>
    %53 = math.exp %52 : vector<8x1xf32>
    %cst_33 = arith.constant 1.000000e+00 : f32
    %54 = vector.broadcast %cst_33 : f32 to vector<8x1xf32>
    %55 = arith.addf %54, %53 : vector<8x1xf32>
    %56 = arith.divf %54, %55 : vector<8x1xf32>
    %c0_34 = arith.constant 0 : index
    %c0_35 = arith.constant 0 : index
    %57 = vector.load %arg11[%c0_34, %c0_35] : memref<8x1xf32, #tpu.memory_space<vmem>>, vector<8x1xf32>
    tpu.vector_store %arg11[%c0_34, %c0_35], %56 {strides = array<i32>} : memref<8x1xf32, #tpu.memory_space<vmem>>, vector<8x1xf32>,
    return
  }
  func.func @transform_0(%arg0: i32) -> (i32, i32) {
    %c0_i32 = arith.constant 0 : i32
    %c0_i32_0 = arith.constant 0 : i32
    return %arg0, %c0_i32 : i32, i32
  }
  func.func @transform_1(%arg0: i32) -> (i32, i32, i32) {
    %c0_i32 = arith.constant 0 : i32
    %c0_i32_0 = arith.constant 0 : i32
    %c0_i32_1 = arith.constant 0 : i32
    %c0_i32_2 = arith.constant 0 : i32
    return %c0_i32, %c0_i32_0, %c0_i32_1 : i32, i32, i32
  }
  func.func @transform_2(%arg0: i32) -> (i32, i32, i32) {
    %c0_i32 = arith.constant 0 : i32
    %c0_i32_0 = arith.constant 0 : i32
    %c0_i32_1 = arith.constant 0 : i32
    %c0_i32_2 = arith.constant 0 : i32
    return %c0_i32, %c0_i32_0, %c0_i32_1 : i32, i32, i32
  }
  func.func @transform_3(%arg0: i32) -> (i32, i32) {
    %c0_i32 = arith.constant 0 : i32
    %c0_i32_0 = arith.constant 0 : i32
    %c0_i32_1 = arith.constant 0 : i32
    return %c0_i32, %c0_i32_0 : i32, i32
  }
  func.func @transform_4(%arg0: i32) -> (i32, i32) {
    %c0_i32 = arith.constant 0 : i32
    %c0_i32_0 = arith.constant 0 : i32
    %c0_i32_1 = arith.constant 0 : i32
    return %c0_i32, %c0_i32_0 : i32, i32
  }
  func.func @transform_5(%arg0: i32) -> (i32, i32) {
    %c0_i32 = arith.constant 0 : i32
    %c0_i32_0 = arith.constant 0 : i32
    %c0_i32_1 = arith.constant 0 : i32
    return %c0_i32, %c0_i32_0 : i32, i32
  }
  func.func @transform_6(%arg0: i32) -> (i32, i32) {
    %c0_i32 = arith.constant 0 : i32
    %c0_i32_0 = arith.constant 0 : i32
    %c0_i32_1 = arith.constant 0 : i32
    return %c0_i32, %c0_i32_0 : i32, i32
  }
  func.func @transform_7(%arg0: i32) -> (i32, i32) {
    %c0_i32 = arith.constant 0 : i32
    %c0_i32_0 = arith.constant 0 : i32
    %c0_i32_1 = arith.constant 0 : i32
    return %c0_i32, %c0_i32_0 : i32, i32
  }
  func.func @transform_8(%arg0: i32) -> (i32, i32) {
    %c0_i32 = arith.constant 0 : i32
    %c0_i32_0 = arith.constant 0 : i32
    %c0_i32_1 = arith.constant 0 : i32
    return %c0_i32, %c0_i32_0 : i32, i32
  }
  func.func @transform_9(%arg0: i32) -> (i32, i32) {
    %c0_i32 = arith.constant 0 : i32
    %c0_i32_0 = arith.constant 0 : i32
    %c0_i32_1 = arith.constant 0 : i32
    return %c0_i32, %c0_i32_0 : i32, i32
  }
  func.func @transform_10(%arg0: i32) -> (i32, i32) {
    %c0_i32 = arith.constant 0 : i32
    %c0_i32_0 = arith.constant 0 : i32
    return %arg0, %c0_i32 : i32, i32
  }
}

</mosaic_0001>

<bundles_post_ra>
// kernel: tpu_custom_call.1
= control target key start
LH: loop header
LB: loop body
LE: loop exit
PB: predicated region body
PF: predicated region fallthrough
CT: control target
= control target key end

     0   :  { %16 = vsyncpa [#allocation4], 0  ;;  %s1071_s0 = inlined_call_operand.hbm [shape: f32[8,128], index: 0, kind: input, shape index: {}]   ;;  %s1072_s1 = inlined_call_operand.hbm [shape: bf16[2,128,128], index: 1, kind: input, shape index: {}]   ;;  %s1073_s2 = inlined_call_operand.vmem [shape: f32[2,1,128], index: 2, kind: input, shape index: {}]   ;;  %s1074_s3 = inlined_call_operand.hbm [shape: bf16[128,128], index: 3, kind: input, shape index: {}]   ;;  %s1075_s4 = inlined_call_operand.vmem [shape: f32[1,128], index: 4, kind: input, shape index: {}]   ;;  %s1076_s5 = inlined_call_operand.hbm [shape: bf16[128,128], index: 5, kind: input, shape index: {}]   ;;  %s1077_s6 = inlined_call_operand.vmem [shape: f32[1,128], index: 6, kind: input, shape index: {}]   ;;  %s1078_s7 = inlined_call_operand.vmem [shape: f32[1,128], index: 7, kind: input, shape index: {}]   ;;  %s1079_s8 = inlined_call_operand.vmem [shape: f32[1,128], index: 8, kind: input, shape index: {}]   ;;  %s1080_s9 = inlined_call_operand.<no memory space> [shape: f32[1], index: 9, kind: input, shape index: {}]   ;;  %s1081_s10 = inlined_call_operand.hbm [shape: f32[1,8], index: 10, kind: output, shape index: {}]  }
   0x1   :  { %17 = vsyncpa [#allocation7], 0 }
   0x2   :  { %18 = vsyncpa [#allocation10], 0 }
   0x3   :  { %19 = vsyncpa [#allocation5], 0  ;;  %s915_s13 = smov [#allocation6]  }
   0x4   :  { %s35_s14 = sshll.u32 %s915_s13, 4  ;;  %s36_s14 = int_to_ptr.vmem [resolvable:$true] %s35_s14 }
   0x5   :  { %s815_s15 = scalar_lea.vmem %s36_s14, 2048  ;;  %p820_p1 = scmp.lt.s32.totalorder %s36_s14, %s36_s14 }
   0x6   :  { %p816_p0 = scmp.ne.s32.totalorder %s36_s14, %s815_s15  ;;  %p821_p2 = scmp.lt.s32.totalorder %s815_s15, %s815_s15 }
   0x8   :  { %p822_p3 = por %p821_p2, %p820_p1 }
   0xa   :  { %p823_p4 = pnand %p822_p3, %p816_p0 }
   0xc   :  { %826 = shalt.err (!%p823_p4)
}
   0xd   :  { %s916_s16 = smov 64   ;;  %s917_s17 = smov 4  }
   0xe   :  { %41 = dma.hbm_to_vmem [thread:$0]  %s1072_s1, 2048, %s36_s14, [#allocation7], %s916_s16, %s916_s16, %s917_s17  }
   0xf   :  { %s918_s20 = smov [#allocation3]   ;;  %s919_s22 = smov [#allocation8]  }
  0x10   :  { %s26_s21 = sshll.u32 %s918_s20, 4  ;;  %s49_s23 = sshll.u32 %s919_s22, 4  ;;  %s27_s21 = int_to_ptr.vmem [resolvable:$true] %s26_s21  ;;  %s50_s23 = int_to_ptr.vmem [resolvable:$true] %s49_s23 }
  0x11   :  { %s835_s24 = scalar_lea.vmem %s27_s21, 128  ;;  %p840_p6 = scmp.lt.s32.totalorder %s27_s21, %s27_s21 }
  0x12   :  { %p836_p5 = scmp.ne.s32.totalorder %s27_s21, %s835_s24  ;;  %p841_p7 = scmp.lt.s32.totalorder %s835_s24, %s835_s24 }
  0x14   :  { %p842_p8 = por %p841_p7, %p840_p6 }
  0x16   :  { %p843_p9 = pnand %p842_p8, %p836_p5 }
  0x18   :  { %846 = shalt.err (!%p843_p9)
}
  0x19   :  { %29 = dma.hbm_to_vmem [thread:$0]  %s1071_s0, 128, %s27_s21, [#allocation4]  }
  0x1a   :  { %s855_s27 = scalar_lea.vmem %s50_s23, 1024  ;;  %p860_p11 = scmp.lt.s32.totalorder %s50_s23, %s50_s23 }
  0x1b   :  { %p856_p10 = scmp.ne.s32.totalorder %s50_s23, %s855_s27  ;;  %p861_p12 = scmp.lt.s32.totalorder %s855_s27, %s855_s27 }
  0x1d   :  { %p862_p13 = por %p861_p12, %p860_p11 }
  0x1f   :  { %p863_p0 = pnand %p862_p13, %p856_p10 }
  0x21   :  { %866 = shalt.err (!%p863_p0)
}
  0x22   :  { %55 = dma.hbm_to_vmem [thread:$0]  %s1074_s3, 1024, %s50_s23, [#allocation7], %s916_s16, %s916_s16, %s917_s17  }
  0x23   :  { %s920_s29 = smov [#allocation9]  }
  0x24   :  { %s63_s30 = sshll.u32 %s920_s29, 4  ;;  %s64_s30 = int_to_ptr.vmem [resolvable:$true] %s63_s30 }
  0x25   :  { %s875_s11 = scalar_lea.vmem %s64_s30, 1024  ;;  %p880_p2 = scmp.lt.s32.totalorder %s64_s30, %s64_s30 }
  0x26   :  { %p876_p1 = scmp.ne.s32.totalorder %s64_s30, %s875_s11  ;;  %p881_p3 = scmp.lt.s32.totalorder %s875_s11, %s875_s11 }
  0x28   :  { %p882_p4 = por %p881_p3, %p880_p2 }
  0x2a   :  { %p883_p5 = pnand %p882_p4, %p876_p1 }
  0x2c   :  { %886 = shalt.err (!%p883_p5)
}
  0x2d   :  { %69 = dma.hbm_to_vmem [thread:$0]  %s1076_s5, 1024, %s64_s30, [#allocation10], %s916_s16, %s916_s16, %s917_s17  }
  0x2e   :  { %907 = dma.done.wait [#allocation4], 128  }
  0x2f   :  { %908 = vsyncadd [#allocation4], 4294967168 }
  0x30   :  { %909 = dma.done.wait [#allocation7], 3072  }
  0x31   :  { %910 = vsyncadd [#allocation7], 4294964224 }
  0x32   :  { %911 = dma.done.wait [#allocation10], 1024  }
  0x33   :  { %912 = vsyncadd [#allocation10], 4294966272  ;;  %v921_v0 = vmov 0.0   ;;  %vm922_vm0 = vmmov 0   ;;  %v771_v1 = vld [vmem:[#allocation6 + $0x38] sm:$0xff]   ;;  %v772_v2 = vld [vmem:[#allocation6 + $0x30] sm:$0xff]  }
  0x34   :  { %682 = vmatprep.subr.bf16.mxu0 %v921_v0  ;;  %698 = vmatprep.mubr.msk.bf16.mxu0 %vm922_vm0, %v921_v0  ;;  %v773_v3 = vld [vmem:[#allocation6 + $0x28] sm:$0xff]   ;;  %v774_v4 = vld [vmem:[#allocation6 + $0x20] sm:$0xff]   ;;  %v775_v5 = vld [vmem:[#allocation6 + $0x18] sm:$0xff]   ;;  %vm587_vm1 = vcmask 57344  }
  0x35   :  { %702 = vmatprep.subr.bf16.mxu1 %v921_v0  ;;  %718 = vmatprep.mubr.msk.bf16.mxu1 %vm922_vm0, %v921_v0  ;;  %v787_v6 = vld [vmem:[#allocation6 + $0x78] sm:$0xff]   ;;  %v776_v7 = vld [vmem:[#allocation6 + $0x10] sm:$0xff]   ;;  %v777_v9 = vld [vmem:[#allocation6 + $0x8] sm:$0xff]  }
  0x36   :  { %683 = vmatpush3.bf16.msra.mxu0 %v771_v1  ;;  %703 = vmatpush3.bf16.msra.mxu1 %v787_v6  ;;  %v788_v8 = vld [vmem:[#allocation6 + $0x70] sm:$0xff]   ;;  %v789_v10 = vld [vmem:[#allocation6 + $0x68] sm:$0xff]   ;;  %v778_v11 = vld [vmem:[#allocation6] sm:$0xff]  }
  0x37   :  { %684 = vmatprep.subr.bf16.mxu0 %v921_v0  ;;  %704 = vmatprep.subr.bf16.mxu1 %v921_v0  ;;  %v1013_v12 = vld [vmem:[#allocation3] sm:$0xff]  ;;  %v790_v13 = vld [vmem:[#allocation6 + $0x60] sm:$0xff]   ;;  %v780_v17 = vld [vmem:[#allocation8 + $0x30] sm:$0xff]  }
  0x38   :  { %v92_v14 = vpack.c.bf16 %v1013_v12, %v1013_v12  ;;  %v779_v15 = vld [vmem:[#allocation8 + $0x38] sm:$0xff]   ;;  %v792_v18 = vld [vmem:[#allocation6 + $0x50] sm:$0xff]   ;;  %v781_v19 = vld [vmem:[#allocation8 + $0x28] sm:$0xff]  }
  0x39   :  { %v791_v16 = vld [vmem:[#allocation6 + $0x58] sm:$0xff]   ;;  %v782_v20 = vld [vmem:[#allocation8 + $0x20] sm:$0xff]   ;;  %v784_v22 = vld [vmem:[#allocation8 + $0x10] sm:$0xff]  }
  0x3a   :  { %685 = vmatpush3.bf16.msra.mxu0 %v772_v2  ;;  %705 = vmatpush3.bf16.msra.mxu1 %v788_v8  ;;  %v783_v21 = vld [vmem:[#allocation8 + $0x18] sm:$0xff]   ;;  %v785_v23 = vld [vmem:[#allocation8 + $0x8] sm:$0xff]   ;;  %v786_v24 = vld [vmem:[#allocation8] sm:$0xff]   ;;  %v571_v8 = vstv %s1080_s9 }
  0x3b   :  { %686 = vmatprep.subr.bf16.mxu0 %v921_v0  ;;  %706 = vmatprep.subr.bf16.mxu1 %v921_v0  ;;  %v793_v25 = vld [vmem:[#allocation6 + $0x48] sm:$0xff]   ;;  %v794_v26 = vld [vmem:[#allocation6 + $0x40] sm:$0xff]   ;;  %v614_v28 = vld [vmem:[%s1073_s2] ss:$0 sm:$0xff] }
  0x3c   :  { %v795_v35 = vld [vmem:[#allocation9 + $0x38] sm:$0xff]   ;;  %v796_v37 = vld [vmem:[#allocation9 + $0x30] sm:$0xff]   ;;  %v797_v38 = vld [vmem:[#allocation9 + $0x28] sm:$0xff]  }
  0x3d   :  { %v798_v39 = vld [vmem:[#allocation9 + $0x20] sm:$0xff]   ;;  %v799_v40 = vld [vmem:[#allocation9 + $0x18] sm:$0xff]   ;;  %v800_v41 = vld [vmem:[#allocation9 + $0x10] sm:$0xff]  }
  0x3e   :  { %687 = vmatpush3.bf16.msra.mxu0 %v773_v3  ;;  %707 = vmatpush3.bf16.msra.mxu1 %v789_v10  ;;  %v625_v42 = vld [vmem:[%s1075_s4] ss:$0 sm:$0xff]  ;;  %v801_v43 = vld [vmem:[#allocation9 + $0x8] sm:$0xff]   ;;  %v802_v47 = vld [vmem:[#allocation9] sm:$0xff]  }
  0x3f   :  { %688 = vmatprep.subr.bf16.mxu0 %v921_v0  ;;  %708 = vmatprep.subr.bf16.mxu1 %v921_v0  ;;  %v624_v53 = vld [vmem:[%s1073_s2 + $0x1] ss:$0 sm:$0xff]  ;;  %v643_v58 = vld [vmem:[%s1078_s7] ss:$0 sm:$0xff] }
  0x40   :  { %v634_v62 = vld [vmem:[%s1077_s6] ss:$0 sm:$0xff]  ;;  %s923_s6 = smov [#allocation11]  }
  0x41   :  { %v644_v2 = vld [vmem:[%s1079_s8] ss:$0 sm:$0xff]  ;;  %s595_s8 = sshll.u32 %s923_s6, 4  ;;  %s596_s8 = int_to_ptr.vmem [resolvable:$true] %s595_s8 }
  0x42   :  { %689 = vmatpush3.bf16.msra.mxu0 %v774_v4  ;;  %709 = vmatpush3.bf16.msra.mxu1 %v790_v13  ;;  %s887_s9 = scalar_lea.vmem %s596_s8, 16  ;;  %s891_s22 = scalar_lea.vmem %s596_s8, 32 }
  0x43   :  { %690 = vmatprep.subr.bf16.mxu0 %v921_v0  ;;  %710 = vmatprep.subr.bf16.mxu1 %v921_v0  ;;  %p888_p6 = scmp.ne.s32.totalorder %s596_s8, %s887_s9  ;;  %p892_p7 = scmp.lt.s32.totalorder %s596_s8, %s596_s8 }
  0x44   :  { %p893_p8 = scmp.lt.s32.totalorder %s891_s22, %s887_s9 }
  0x46   :  { %691 = vmatpush3.bf16.msra.mxu0 %v775_v5  ;;  %711 = vmatpush3.bf16.msra.mxu1 %v791_v16  ;;  %p894_p9 = por %p893_p8, %p892_p7 }
  0x47   :  { %692 = vmatprep.subr.bf16.mxu0 %v921_v0  ;;  %712 = vmatprep.subr.bf16.mxu1 %v921_v0 }
  0x48   :  { %p895_p10 = pnand %p894_p9, %p888_p6 }
  0x4a   :  { %693 = vmatpush3.bf16.msra.mxu0 %v776_v7  ;;  %713 = vmatpush3.bf16.msra.mxu1 %v792_v18 }
  0x4b   :  { %694 = vmatprep.subr.bf16.mxu0 %v921_v0  ;;  %714 = vmatprep.subr.bf16.mxu1 %v921_v0 }
  0x4e   :  { %695 = vmatpush3.bf16.msra.mxu0 %v777_v9  ;;  %715 = vmatpush3.bf16.msra.mxu1 %v793_v25 }
  0x4f   :  { %696 = vmatprep.subr.bf16.mxu0 %v921_v0  ;;  %716 = vmatprep.subr.bf16.mxu1 %v921_v0 }
  0x52   :  { %697 = vmatpush3.bf16.msra.mxu0 %v778_v11  ;;  %717 = vmatpush3.bf16.msra.mxu1 %v794_v26 }
  0x53   :  { %722 = vmatprep.subr.bf16.mxu0 %v921_v0  ;;  %742 = vmatprep.subr.bf16.mxu1 %v921_v0 }
  0x55   :  { %699 = vmatmul.mubr.bf16.vlgmr.msra.gmra.mxu0 %v92_v14 }
  0x56   :  { %723 = vmatpush3.bf16.msra.mxu0 %v779_v15  ;;  %738 = vmatprep.mubr.msk.bf16.mxu0 %vm922_vm0, %v921_v0  ;;  %v580_v15 = vlaneseq }
  0x57   :  { %724 = vmatprep.subr.bf16.mxu0 %v921_v0 }
  0x58   :  { %v581_v16 = vand.u32 127, %v580_v15 }
  0x5a   :  { %725 = vmatpush3.bf16.msra.mxu0 %v780_v17  ;;  %v583_v17 = vshrl.u32 %v580_v15, 7 }
  0x5b   :  { %726 = vmatprep.subr.bf16.mxu0 %v921_v0 }
  0x5c   :  { %v584_v18 = vsub.s32 %v581_v16, %v583_v17 }
  0x5e   :  { %727 = vmatpush3.bf16.msra.mxu0 %v781_v19 }
  0x5f   :  { %728 = vmatprep.subr.bf16.mxu0 %v921_v0 }
  0x62   :  { %729 = vmatpush3.bf16.msra.mxu0 %v782_v20 }
  0x63   :  { %730 = vmatprep.subr.bf16.mxu0 %v921_v0 }
  0x66   :  { %731 = vmatpush3.bf16.msra.mxu0 %v783_v21 }
  0x67   :  { %732 = vmatprep.subr.bf16.mxu0 %v921_v0 }
  0x6a   :  { %733 = vmatpush3.bf16.msra.mxu0 %v784_v22 }
  0x6b   :  { %734 = vmatprep.subr.bf16.mxu0 %v921_v0 }
  0x6e   :  { %735 = vmatpush3.bf16.msra.mxu0 %v785_v23 }
  0x6f   :  { %736 = vmatprep.subr.bf16.mxu0 %v921_v0 }
  0x72   :  { %737 = vmatpush3.bf16.msra.mxu0 %v786_v24 }
  0x75   :  { %739 = vmatmul.mubr.bf16.vlgmr.msra.gmra.mxu0 %v92_v14 }
 0x115   :  { %v191_v27 = vpop.f32.mrf.mxu0 }
 0x116   :  { %v197_v29 = vmul.f32 %v191_v27, %v1013_v12 }
 0x117   :  { %v700_v30 = vpop.f32.mrf.mxu0 }
 0x118   :  { %v205_v31 = vadd.f32 %v614_v28, %v197_v29 }
 0x119   :  { %v194_v32 = vpop.f32.mrf.mxu0 }
 0x11a   :  { %v206_v33 = vadd.f32 %v205_v31, %v1013_v12 }
 0x11b   :  { %v701_v34 = vpop.f32.mrf.mxu0 }
 0x11c   :  { %v207_v36 = vpack.c.bf16 %v206_v33, %v206_v33 }
 0x11e   :  { %719 = vmatmul.mubr.bf16.vlgmr.msra.gmra.mxu1 %v207_v36 }
 0x11f   :  { %743 = vmatpush3.bf16.msra.mxu1 %v795_v35  ;;  %758 = vmatprep.mubr.msk.bf16.mxu1 %vm922_vm0, %v921_v0 }
 0x120   :  { %744 = vmatprep.subr.bf16.mxu1 %v921_v0 }
 0x123   :  { %745 = vmatpush3.bf16.msra.mxu1 %v796_v37 }
 0x124   :  { %746 = vmatprep.subr.bf16.mxu1 %v921_v0 }
 0x127   :  { %747 = vmatpush3.bf16.msra.mxu1 %v797_v38 }
 0x128   :  { %748 = vmatprep.subr.bf16.mxu1 %v921_v0 }
 0x12b   :  { %749 = vmatpush3.bf16.msra.mxu1 %v798_v39 }
 0x12c   :  { %750 = vmatprep.subr.bf16.mxu1 %v921_v0 }
 0x12f   :  { %751 = vmatpush3.bf16.msra.mxu1 %v799_v40 }
 0x130   :  { %752 = vmatprep.subr.bf16.mxu1 %v921_v0 }
 0x133   :  { %753 = vmatpush3.bf16.msra.mxu1 %v800_v41 }
 0x134   :  { %754 = vmatprep.subr.bf16.mxu1 %v921_v0 }
 0x135   :  { %v429_v44 = vpop.f32.mrf.mxu0 }
 0x136   :  { %v430_v45 = vadd.f32 %v625_v42, %v429_v44 }
 0x137   :  { %755 = vmatpush3.bf16.msra.mxu1 %v801_v43  ;;  %v740_v46 = vpop.f32.mrf.mxu0 }
 0x138   :  { %v435_v48 = vmax.f32 %v430_v45, 0.0  ;;  %756 = vmatprep.subr.bf16.mxu1 %v921_v0 }
 0x139   :  { %v432_v49 = vpop.f32.mrf.mxu0 }
 0x13a   :  { %v436_v50 = vpack.c.bf16 %v435_v48, %v435_v48 }
 0x13b   :  { %757 = vmatpush3.bf16.msra.mxu1 %v802_v47  ;;  %v741_v51 = vpop.f32.mrf.mxu0 }
 0x13e   :  { %759 = vmatmul.mubr.bf16.vlgmr.msra.gmra.mxu1 %v436_v50 }
 0x1de   :  { %v307_v52 = vpop.f32.mrf.mxu1 }
 0x1df   :  { %v313_v54 = vmul.f32 %v307_v52, %v1013_v12 }
 0x1e0   :  { %v720_v55 = vpop.f32.mrf.mxu1 }
 0x1e1   :  { %v322_v56 = vadd.f32 %v624_v53, %v313_v54 }
 0x1e2   :  { %v310_v57 = vpop.f32.mrf.mxu1 }
 0x1e3   :  { %v323_v59 = vadd.f32 %v322_v56, %v206_v33 }
 0x1e4   :  { %v721_v60 = vpop.f32.mrf.mxu1 }
 0x1e5   :  { %v557_v61 = vmul.f32 %v643_v58, %v323_v59 }
 0x1e7   :  { %558 = vadd.xlane.f32.xlu0 %v557_v61 }
 0x1fe   :  { %v542_v63 = vpop.f32.mrf.mxu1 }
 0x1ff   :  { %v543_v0 = vadd.f32 %v634_v62, %v542_v63 }
 0x200   :  { %v760_v1 = vpop.f32.mrf.mxu1 }
 0x201   :  { %v548_v3 = vmax.f32 %v543_v0, 0.0 }
 0x202   :  { %v545_v4 = vpop.f32.mrf.mxu1 }
 0x203   :  { %v567_v5 = vmul.f32 %v644_v2, %v548_v3 }
 0x204   :  { %v761_v6 = vpop.f32.mrf.mxu1 }
 0x205   :  { %568 = vadd.xlane.f32.xlu0 %v567_v5 }
 0x270   :  { %v559_v7 = vpop.xlane.xlu0 %558 }
 0x28e   :  { %v569_v9 = vpop.xlane.xlu0 %568 }
 0x28f   :  { %v570_v10 = vadd.f32 %v569_v9, %v559_v7 }
 0x291   :  { %v572_v11 = vadd.f32 %v571_v8, %v570_v10 }
 0x293   :  { %v645_v12 = vmul.f32 -1.442695, %v572_v11 }
 0x295   :  { %803 = vpow2.f32 %v645_v12 }
 0x2a2   :  { %v804_v13 = vpop.eup %803 }
 0x2a3   :  { %v576_v14 = vadd.f32 1.0, %v804_v13 }
 0x2a5   :  { %805 = vrcp.f32 %v576_v14 }
 0x2b2   :  { %v806_v19 = vpop.eup %805 }
 0x2b3   :  { %v585_v20 = vrot.slane %v806_v19, %v584_v18 }
 0x2b5   :  { %588 = vst.msk [vmem:[#allocation11] sm:$0x1] %vm587_vm1, %v585_v20 }
 0x2b6   :  { %898 = shalt.err (!%p895_p10)
}
 0x2b7   :  { %598 = dma.vmem_to_hbm [thread:$0]  %s596_s8, 16, %s1081_s10, [#allocation5]  }
 0x2b8   :  { %913 = dma.done.wait [#allocation5], 16  }
 0x2b9   :  { %914 = vsyncadd [#allocation5], 4294967280 }
 0x2ba   :  { %602 = vsyncpa [#allocation4], 1 }
 0x2bb   :  { %603 = vsyncpa [#allocation7], 1 }
 0x2bc   :  { %604 = vsyncpa [#allocation10], 1 }
 0x2bd   :  { %605 = vsyncpa [#allocation5], 1 }

// kernel: tpu_custom_call.1
= control target key start
LH: loop header
LB: loop body
LE: loop exit
PB: predicated region body
PF: predicated region fallthrough
CT: control target
= control target key end

     0   :  { %16 = vsyncpa [#allocation4], 0  ;;  %s1028_s0 = inlined_call_operand.hbm [shape: f32[8,128], index: 0, kind: input, shape index: {}]   ;;  %s1029_s1 = inlined_call_operand.hbm [shape: bf16[2,128,128], index: 1, kind: input, shape index: {}]   ;;  %s1030_s2 = inlined_call_operand.vmem [shape: f32[2,1,128], index: 2, kind: input, shape index: {}]   ;;  %s1031_s3 = inlined_call_operand.hbm [shape: bf16[128,128], index: 3, kind: input, shape index: {}]   ;;  %s1032_s4 = inlined_call_operand.vmem [shape: f32[1,128], index: 4, kind: input, shape index: {}]   ;;  %s1033_s5 = inlined_call_operand.hbm [shape: bf16[128,128], index: 5, kind: input, shape index: {}]   ;;  %s1034_s6 = inlined_call_operand.vmem [shape: f32[1,128], index: 6, kind: input, shape index: {}]   ;;  %s1035_s7 = inlined_call_operand.vmem [shape: f32[1,128], index: 7, kind: input, shape index: {}]   ;;  %s1036_s8 = inlined_call_operand.vmem [shape: f32[1,128], index: 8, kind: input, shape index: {}]   ;;  %s1037_s9 = inlined_call_operand.<no memory space> [shape: f32[1], index: 9, kind: input, shape index: {}]   ;;  %s1038_s10 = inlined_call_operand.vmem [shape: f32[8,1], index: 10, kind: output, shape index: {}]  }
   0x1   :  { %17 = vsyncpa [#allocation6], 0 }
   0x2   :  { %18 = vsyncpa [#allocation9], 0  ;;  %s873_s13 = smov [#allocation5]  }
   0x3   :  { %s34_s14 = sshll.u32 %s873_s13, 4  ;;  %s35_s14 = int_to_ptr.vmem [resolvable:$true] %s34_s14 }
   0x4   :  { %s795_s15 = scalar_lea.vmem %s35_s14, 2048  ;;  %p800_p1 = scmp.lt.s32.totalorder %s35_s14, %s35_s14 }
   0x5   :  { %p796_p0 = scmp.ne.s32.totalorder %s35_s14, %s795_s15  ;;  %p801_p2 = scmp.lt.s32.totalorder %s795_s15, %s795_s15 }
   0x7   :  { %p802_p3 = por %p801_p2, %p800_p1 }
   0x9   :  { %p803_p4 = pnand %p802_p3, %p796_p0 }
   0xb   :  { %806 = shalt.err (!%p803_p4)
}
   0xc   :  { %s874_s16 = smov 64   ;;  %s875_s17 = smov 4  }
   0xd   :  { %40 = dma.hbm_to_vmem [thread:$0]  %s1029_s1, 2048, %s35_s14, [#allocation6], %s874_s16, %s874_s16, %s875_s17  }
   0xe   :  { %s876_s20 = smov [#allocation3]   ;;  %s877_s22 = smov [#allocation7]  }
   0xf   :  { %s25_s21 = sshll.u32 %s876_s20, 4  ;;  %s48_s23 = sshll.u32 %s877_s22, 4  ;;  %s26_s21 = int_to_ptr.vmem [resolvable:$true] %s25_s21  ;;  %s49_s23 = int_to_ptr.vmem [resolvable:$true] %s48_s23 }
  0x10   :  { %s815_s24 = scalar_lea.vmem %s26_s21, 128  ;;  %p820_p6 = scmp.lt.s32.totalorder %s26_s21, %s26_s21 }
  0x11   :  { %p816_p5 = scmp.ne.s32.totalorder %s26_s21, %s815_s24  ;;  %p821_p7 = scmp.lt.s32.totalorder %s815_s24, %s815_s24 }
  0x13   :  { %p822_p8 = por %p821_p7, %p820_p6 }
  0x15   :  { %p823_p9 = pnand %p822_p8, %p816_p5 }
  0x17   :  { %826 = shalt.err (!%p823_p9)
}
  0x18   :  { %28 = dma.hbm_to_vmem [thread:$0]  %s1028_s0, 128, %s26_s21, [#allocation4]  }
  0x19   :  { %s835_s27 = scalar_lea.vmem %s49_s23, 1024  ;;  %p840_p11 = scmp.lt.s32.totalorder %s49_s23, %s49_s23 }
  0x1a   :  { %p836_p10 = scmp.ne.s32.totalorder %s49_s23, %s835_s27  ;;  %p841_p12 = scmp.lt.s32.totalorder %s835_s27, %s835_s27 }
  0x1c   :  { %p842_p13 = por %p841_p12, %p840_p11 }
  0x1e   :  { %p843_p0 = pnand %p842_p13, %p836_p10 }
  0x20   :  { %846 = shalt.err (!%p843_p0)
}
  0x21   :  { %54 = dma.hbm_to_vmem [thread:$0]  %s1031_s3, 1024, %s49_s23, [#allocation6], %s874_s16, %s874_s16, %s875_s17  }
  0x22   :  { %s878_s29 = smov [#allocation8]  }
  0x23   :  { %s62_s30 = sshll.u32 %s878_s29, 4  ;;  %s63_s30 = int_to_ptr.vmem [resolvable:$true] %s62_s30 }
  0x24   :  { %s855_s11 = scalar_lea.vmem %s63_s30, 1024  ;;  %p860_p2 = scmp.lt.s32.totalorder %s63_s30, %s63_s30 }
  0x25   :  { %p856_p1 = scmp.ne.s32.totalorder %s63_s30, %s855_s11  ;;  %p861_p3 = scmp.lt.s32.totalorder %s855_s11, %s855_s11 }
  0x27   :  { %p862_p4 = por %p861_p3, %p860_p2 }
  0x29   :  { %p863_p5 = pnand %p862_p4, %p856_p1 }
  0x2b   :  { %866 = shalt.err (!%p863_p5)
}
  0x2c   :  { %68 = dma.hbm_to_vmem [thread:$0]  %s1033_s5, 1024, %s63_s30, [#allocation9], %s874_s16, %s874_s16, %s875_s17  }
  0x2d   :  { %867 = dma.done.wait [#allocation4], 128  }
  0x2e   :  { %868 = vsyncadd [#allocation4], 4294967168 }
  0x2f   :  { %869 = dma.done.wait [#allocation6], 3072  }
  0x30   :  { %870 = vsyncadd [#allocation6], 4294964224 }
  0x31   :  { %871 = dma.done.wait [#allocation9], 1024  }
  0x32   :  { %872 = vsyncadd [#allocation9], 4294966272  ;;  %v879_v0 = vmov 0.0   ;;  %vm880_vm0 = vmmov 0   ;;  %v751_v1 = vld [vmem:[#allocation5 + $0x38] sm:$0xff]   ;;  %v752_v2 = vld [vmem:[#allocation5 + $0x30] sm:$0xff]  }
  0x33   :  { %663 = vmatprep.subr.bf16.mxu0 %v879_v0  ;;  %679 = vmatprep.mubr.msk.bf16.mxu0 %vm880_vm0, %v879_v0  ;;  %v753_v3 = vld [vmem:[#allocation5 + $0x28] sm:$0xff]   ;;  %v754_v4 = vld [vmem:[#allocation5 + $0x20] sm:$0xff]   ;;  %v755_v5 = vld [vmem:[#allocation5 + $0x18] sm:$0xff]   ;;  %vm578_vm1 = vcmask 7168  }
  0x34   :  { %683 = vmatprep.subr.bf16.mxu1 %v879_v0  ;;  %699 = vmatprep.mubr.msk.bf16.mxu1 %vm880_vm0, %v879_v0  ;;  %v767_v6 = vld [vmem:[#allocation5 + $0x78] sm:$0xff]   ;;  %v756_v7 = vld [vmem:[#allocation5 + $0x10] sm:$0xff]   ;;  %v757_v9 = vld [vmem:[#allocation5 + $0x8] sm:$0xff]  }
  0x35   :  { %664 = vmatpush3.bf16.msra.mxu0 %v751_v1  ;;  %684 = vmatpush3.bf16.msra.mxu1 %v767_v6  ;;  %v768_v8 = vld [vmem:[#allocation5 + $0x70] sm:$0xff]   ;;  %v769_v10 = vld [vmem:[#allocation5 + $0x68] sm:$0xff]   ;;  %v758_v11 = vld [vmem:[#allocation5] sm:$0xff]  }
  0x36   :  { %665 = vmatprep.subr.bf16.mxu0 %v879_v0  ;;  %685 = vmatprep.subr.bf16.mxu1 %v879_v0  ;;  %v970_v12 = vld [vmem:[#allocation3] sm:$0xff]  ;;  %v770_v13 = vld [vmem:[#allocation5 + $0x60] sm:$0xff]   ;;  %v760_v17 = vld [vmem:[#allocation7 + $0x30] sm:$0xff]  }
  0x37   :  { %v91_v14 = vpack.c.bf16 %v970_v12, %v970_v12  ;;  %v759_v15 = vld [vmem:[#allocation7 + $0x38] sm:$0xff]   ;;  %v772_v18 = vld [vmem:[#allocation5 + $0x50] sm:$0xff]   ;;  %v761_v19 = vld [vmem:[#allocation7 + $0x28] sm:$0xff]  }
  0x38   :  { %v771_v16 = vld [vmem:[#allocation5 + $0x58] sm:$0xff]   ;;  %v762_v20 = vld [vmem:[#allocation7 + $0x20] sm:$0xff]   ;;  %v764_v22 = vld [vmem:[#allocation7 + $0x10] sm:$0xff]  }
  0x39   :  { %666 = vmatpush3.bf16.msra.mxu0 %v752_v2  ;;  %686 = vmatpush3.bf16.msra.mxu1 %v768_v8  ;;  %v763_v21 = vld [vmem:[#allocation7 + $0x18] sm:$0xff]   ;;  %v765_v23 = vld [vmem:[#allocation7 + $0x8] sm:$0xff]   ;;  %v766_v24 = vld [vmem:[#allocation7] sm:$0xff]   ;;  %v570_v8 = vstv %s1037_s9 }
  0x3a   :  { %667 = vmatprep.subr.bf16.mxu0 %v879_v0  ;;  %687 = vmatprep.subr.bf16.mxu1 %v879_v0  ;;  %v773_v25 = vld [vmem:[#allocation5 + $0x48] sm:$0xff]   ;;  %v774_v26 = vld [vmem:[#allocation5 + $0x40] sm:$0xff]   ;;  %v595_v28 = vld [vmem:[%s1030_s2] ss:$0 sm:$0xff] }
  0x3b   :  { %v775_v35 = vld [vmem:[#allocation8 + $0x38] sm:$0xff]   ;;  %v776_v37 = vld [vmem:[#allocation8 + $0x30] sm:$0xff]   ;;  %v777_v38 = vld [vmem:[#allocation8 + $0x28] sm:$0xff]  }
  0x3c   :  { %v778_v39 = vld [vmem:[#allocation8 + $0x20] sm:$0xff]   ;;  %v779_v40 = vld [vmem:[#allocation8 + $0x18] sm:$0xff]   ;;  %v780_v41 = vld [vmem:[#allocation8 + $0x10] sm:$0xff]  }
  0x3d   :  { %668 = vmatpush3.bf16.msra.mxu0 %v753_v3  ;;  %688 = vmatpush3.bf16.msra.mxu1 %v769_v10  ;;  %v606_v42 = vld [vmem:[%s1032_s4] ss:$0 sm:$0xff]  ;;  %v781_v43 = vld [vmem:[#allocation8 + $0x8] sm:$0xff]   ;;  %v782_v47 = vld [vmem:[#allocation8] sm:$0xff]  }
  0x3e   :  { %669 = vmatprep.subr.bf16.mxu0 %v879_v0  ;;  %689 = vmatprep.subr.bf16.mxu1 %v879_v0  ;;  %v605_v53 = vld [vmem:[%s1030_s2 + $0x1] ss:$0 sm:$0xff]  ;;  %v624_v58 = vld [vmem:[%s1035_s7] ss:$0 sm:$0xff] }
  0x3f   :  { %v615_v62 = vld [vmem:[%s1034_s6] ss:$0 sm:$0xff] }
  0x40   :  { %v625_v2 = vld [vmem:[%s1036_s8] ss:$0 sm:$0xff] }
  0x41   :  { %670 = vmatpush3.bf16.msra.mxu0 %v754_v4  ;;  %690 = vmatpush3.bf16.msra.mxu1 %v770_v13 }
  0x42   :  { %671 = vmatprep.subr.bf16.mxu0 %v879_v0  ;;  %691 = vmatprep.subr.bf16.mxu1 %v879_v0 }
  0x45   :  { %672 = vmatpush3.bf16.msra.mxu0 %v755_v5  ;;  %692 = vmatpush3.bf16.msra.mxu1 %v771_v16 }
  0x46   :  { %673 = vmatprep.subr.bf16.mxu0 %v879_v0  ;;  %693 = vmatprep.subr.bf16.mxu1 %v879_v0 }
  0x49   :  { %674 = vmatpush3.bf16.msra.mxu0 %v756_v7  ;;  %694 = vmatpush3.bf16.msra.mxu1 %v772_v18 }
  0x4a   :  { %675 = vmatprep.subr.bf16.mxu0 %v879_v0  ;;  %695 = vmatprep.subr.bf16.mxu1 %v879_v0 }
  0x4d   :  { %676 = vmatpush3.bf16.msra.mxu0 %v757_v9  ;;  %696 = vmatpush3.bf16.msra.mxu1 %v773_v25 }
  0x4e   :  { %677 = vmatprep.subr.bf16.mxu0 %v879_v0  ;;  %697 = vmatprep.subr.bf16.mxu1 %v879_v0 }
  0x51   :  { %678 = vmatpush3.bf16.msra.mxu0 %v758_v11  ;;  %698 = vmatpush3.bf16.msra.mxu1 %v774_v26 }
  0x52   :  { %703 = vmatprep.subr.bf16.mxu0 %v879_v0  ;;  %723 = vmatprep.subr.bf16.mxu1 %v879_v0 }
  0x54   :  { %680 = vmatmul.mubr.bf16.vlgmr.msra.gmra.mxu0 %v91_v14 }
  0x55   :  { %704 = vmatpush3.bf16.msra.mxu0 %v759_v15  ;;  %719 = vmatprep.mubr.msk.bf16.mxu0 %vm880_vm0, %v879_v0 }
  0x56   :  { %705 = vmatprep.subr.bf16.mxu0 %v879_v0 }
  0x59   :  { %706 = vmatpush3.bf16.msra.mxu0 %v760_v17 }
  0x5a   :  { %707 = vmatprep.subr.bf16.mxu0 %v879_v0 }
  0x5d   :  { %708 = vmatpush3.bf16.msra.mxu0 %v761_v19 }
  0x5e   :  { %709 = vmatprep.subr.bf16.mxu0 %v879_v0 }
  0x61   :  { %710 = vmatpush3.bf16.msra.mxu0 %v762_v20 }
  0x62   :  { %711 = vmatprep.subr.bf16.mxu0 %v879_v0 }
  0x65   :  { %712 = vmatpush3.bf16.msra.mxu0 %v763_v21 }
  0x66   :  { %713 = vmatprep.subr.bf16.mxu0 %v879_v0 }
  0x69   :  { %714 = vmatpush3.bf16.msra.mxu0 %v764_v22 }
  0x6a   :  { %715 = vmatprep.subr.bf16.mxu0 %v879_v0 }
  0x6d   :  { %716 = vmatpush3.bf16.msra.mxu0 %v765_v23 }
  0x6e   :  { %717 = vmatprep.subr.bf16.mxu0 %v879_v0 }
  0x71   :  { %718 = vmatpush3.bf16.msra.mxu0 %v766_v24 }
  0x74   :  { %720 = vmatmul.mubr.bf16.vlgmr.msra.gmra.mxu0 %v91_v14 }
 0x114   :  { %v190_v27 = vpop.f32.mrf.mxu0 }
 0x115   :  { %v196_v29 = vmul.f32 %v190_v27, %v970_v12 }
 0x116   :  { %v681_v30 = vpop.f32.mrf.mxu0 }
 0x117   :  { %v204_v31 = vadd.f32 %v595_v28, %v196_v29 }
 0x118   :  { %v193_v32 = vpop.f32.mrf.mxu0 }
 0x119   :  { %v205_v33 = vadd.f32 %v204_v31, %v970_v12 }
 0x11a   :  { %v682_v34 = vpop.f32.mrf.mxu0 }
 0x11b   :  { %v206_v36 = vpack.c.bf16 %v205_v33, %v205_v33 }
 0x11d   :  { %700 = vmatmul.mubr.bf16.vlgmr.msra.gmra.mxu1 %v206_v36 }
 0x11e   :  { %724 = vmatpush3.bf16.msra.mxu1 %v775_v35  ;;  %739 = vmatprep.mubr.msk.bf16.mxu1 %vm880_vm0, %v879_v0 }
 0x11f   :  { %725 = vmatprep.subr.bf16.mxu1 %v879_v0 }
 0x122   :  { %726 = vmatpush3.bf16.msra.mxu1 %v776_v37 }
 0x123   :  { %727 = vmatprep.subr.bf16.mxu1 %v879_v0 }
 0x126   :  { %728 = vmatpush3.bf16.msra.mxu1 %v777_v38 }
 0x127   :  { %729 = vmatprep.subr.bf16.mxu1 %v879_v0 }
 0x12a   :  { %730 = vmatpush3.bf16.msra.mxu1 %v778_v39 }
 0x12b   :  { %731 = vmatprep.subr.bf16.mxu1 %v879_v0 }
 0x12e   :  { %732 = vmatpush3.bf16.msra.mxu1 %v779_v40 }
 0x12f   :  { %733 = vmatprep.subr.bf16.mxu1 %v879_v0 }
 0x132   :  { %734 = vmatpush3.bf16.msra.mxu1 %v780_v41 }
 0x133   :  { %735 = vmatprep.subr.bf16.mxu1 %v879_v0 }
 0x134   :  { %v428_v44 = vpop.f32.mrf.mxu0 }
 0x135   :  { %v429_v45 = vadd.f32 %v606_v42, %v428_v44 }
 0x136   :  { %736 = vmatpush3.bf16.msra.mxu1 %v781_v43  ;;  %v721_v46 = vpop.f32.mrf.mxu0 }
 0x137   :  { %v434_v48 = vmax.f32 %v429_v45, 0.0  ;;  %737 = vmatprep.subr.bf16.mxu1 %v879_v0 }
 0x138   :  { %v431_v49 = vpop.f32.mrf.mxu0 }
 0x139   :  { %v435_v50 = vpack.c.bf16 %v434_v48, %v434_v48 }
 0x13a   :  { %738 = vmatpush3.bf16.msra.mxu1 %v782_v47  ;;  %v722_v51 = vpop.f32.mrf.mxu0 }
 0x13d   :  { %740 = vmatmul.mubr.bf16.vlgmr.msra.gmra.mxu1 %v435_v50 }
 0x1dd   :  { %v306_v52 = vpop.f32.mrf.mxu1 }
 0x1de   :  { %v312_v54 = vmul.f32 %v306_v52, %v970_v12 }
 0x1df   :  { %v701_v55 = vpop.f32.mrf.mxu1 }
 0x1e0   :  { %v321_v56 = vadd.f32 %v605_v53, %v312_v54 }
 0x1e1   :  { %v309_v57 = vpop.f32.mrf.mxu1 }
 0x1e2   :  { %v322_v59 = vadd.f32 %v321_v56, %v205_v33 }
 0x1e3   :  { %v702_v60 = vpop.f32.mrf.mxu1 }
 0x1e4   :  { %v556_v61 = vmul.f32 %v624_v58, %v322_v59 }
 0x1e6   :  { %557 = vadd.xlane.f32.xlu0 %v556_v61 }
 0x1fd   :  { %v541_v63 = vpop.f32.mrf.mxu1 }
 0x1fe   :  { %v542_v0 = vadd.f32 %v615_v62, %v541_v63 }
 0x1ff   :  { %v741_v1 = vpop.f32.mrf.mxu1 }
 0x200   :  { %v547_v3 = vmax.f32 %v542_v0, 0.0 }
 0x201   :  { %v544_v4 = vpop.f32.mrf.mxu1 }
 0x202   :  { %v566_v5 = vmul.f32 %v625_v2, %v547_v3 }
 0x203   :  { %v742_v6 = vpop.f32.mrf.mxu1 }
 0x204   :  { %567 = vadd.xlane.f32.xlu0 %v566_v5 }
 0x26f   :  { %v558_v7 = vpop.xlane.xlu0 %557 }
 0x28d   :  { %v568_v9 = vpop.xlane.xlu0 %567 }
 0x28e   :  { %v569_v10 = vadd.f32 %v568_v9, %v558_v7 }
 0x290   :  { %v571_v11 = vadd.f32 %v570_v8, %v569_v10 }
 0x292   :  { %v626_v12 = vmul.f32 -1.442695, %v571_v11 }
 0x294   :  { %783 = vpow2.f32 %v626_v12 }
 0x2a1   :  { %v784_v13 = vpop.eup %783 }
 0x2a2   :  { %v575_v14 = vadd.f32 1.0, %v784_v13 }
 0x2a4   :  { %785 = vrcp.f32 %v575_v14 }
 0x2b1   :  { %v786_v15 = vpop.eup %785 }
 0x2b2   :  { %579 = vst.msk [vmem:[%s1038_s10] sm:$0xff] %vm578_vm1, %v786_v15 }
 0x2b3   :  { %584 = vsyncpa [#allocation4], 1 }
 0x2b4   :  { %585 = vsyncpa [#allocation6], 1 }
 0x2b5   :  { %586 = vsyncpa [#allocation9], 1 }

// kernel: tpu_custom_call.1
= control target key start
LH: loop header
LB: loop body
LE: loop exit
PB: predicated region body
PF: predicated region fallthrough
CT: control target
= control target key end

     0   :  { %s1032_s0 = inlined_call_operand.hbm [shape: f32[8,128], index: 0, kind: input, shape index: {}]   ;;  %s1033_s1 = inlined_call_operand.hbm [shape: bf16[2,128,128], index: 1, kind: input, shape index: {}]   ;;  %s1034_s2 = inlined_call_operand.vmem [shape: f32[2,1,128], index: 2, kind: input, shape index: {}]   ;;  %s1035_s3 = inlined_call_operand.hbm [shape: bf16[128,128], index: 3, kind: input, shape index: {}]   ;;  %s1036_s4 = inlined_call_operand.vmem [shape: f32[1,128], index: 4, kind: input, shape index: {}]   ;;  %s1037_s5 = inlined_call_operand.hbm [shape: bf16[128,128], index: 5, kind: input, shape index: {}]   ;;  %s1038_s6 = inlined_call_operand.vmem [shape: f32[1,128], index: 6, kind: input, shape index: {}]   ;;  %s1039_s7 = inlined_call_operand.vmem [shape: f32[1,128], index: 7, kind: input, shape index: {}]   ;;  %s1040_s8 = inlined_call_operand.vmem [shape: f32[1,128], index: 8, kind: input, shape index: {}]   ;;  %s1041_s9 = inlined_call_operand.<no memory space> [shape: f32[1,1], index: 9, kind: input, shape index: {}]   ;;  %s1042_s10 = inlined_call_operand.vmem [shape: f32[8,1], index: 10, kind: output, shape index: {}]  }
   0x1   :  { %v15_v0 = vstv %s1041_s9 }
   0x2   :  { %16 = vst [vmem:[#allocation2] sm:$0x1] %v15_v0 }
   0x3   :  { %17 = vsyncpa [#allocation4], 0 }
   0x4   :  { %18 = vsyncpa [#allocation6], 0 }
   0x5   :  { %19 = vsyncpa [#allocation9], 0  ;;  %s877_s15 = smov [#allocation5]  }
   0x6   :  { %s35_s16 = sshll.u32 %s877_s15, 4  ;;  %s36_s16 = int_to_ptr.vmem [resolvable:$true] %s35_s16 }
   0x7   :  { %s799_s17 = scalar_lea.vmem %s36_s16, 2048  ;;  %p804_p1 = scmp.lt.s32.totalorder %s36_s16, %s36_s16 }
   0x8   :  { %p800_p0 = scmp.ne.s32.totalorder %s36_s16, %s799_s17  ;;  %p805_p2 = scmp.lt.s32.totalorder %s799_s17, %s799_s17 }
   0xa   :  { %p806_p3 = por %p805_p2, %p804_p1 }
   0xc   :  { %p807_p4 = pnand %p806_p3, %p800_p0 }
   0xe   :  { %810 = shalt.err (!%p807_p4)
}
   0xf   :  { %s878_s18 = smov 64   ;;  %s879_s19 = smov 4  }
  0x10   :  { %41 = dma.hbm_to_vmem [thread:$0]  %s1033_s1, 2048, %s36_s16, [#allocation6], %s878_s18, %s878_s18, %s879_s19  }
  0x11   :  { %s880_s21 = smov [#allocation3]   ;;  %s881_s23 = smov [#allocation7]  }
  0x12   :  { %s26_s22 = sshll.u32 %s880_s21, 4  ;;  %s49_s24 = sshll.u32 %s881_s23, 4  ;;  %s27_s22 = int_to_ptr.vmem [resolvable:$true] %s26_s22  ;;  %s50_s24 = int_to_ptr.vmem [resolvable:$true] %s49_s24 }
  0x13   :  { %s819_s25 = scalar_lea.vmem %s27_s22, 128  ;;  %p824_p6 = scmp.lt.s32.totalorder %s27_s22, %s27_s22 }
  0x14   :  { %p820_p5 = scmp.ne.s32.totalorder %s27_s22, %s819_s25  ;;  %p825_p7 = scmp.lt.s32.totalorder %s819_s25, %s819_s25 }
  0x16   :  { %p826_p8 = por %p825_p7, %p824_p6 }
  0x18   :  { %p827_p9 = pnand %p826_p8, %p820_p5 }
  0x1a   :  { %830 = shalt.err (!%p827_p9)
}
  0x1b   :  { %29 = dma.hbm_to_vmem [thread:$0]  %s1032_s0, 128, %s27_s22, [#allocation4]  }
  0x1c   :  { %s839_s28 = scalar_lea.vmem %s50_s24, 1024  ;;  %p844_p11 = scmp.lt.s32.totalorder %s50_s24, %s50_s24 }
  0x1d   :  { %p840_p10 = scmp.ne.s32.totalorder %s50_s24, %s839_s28  ;;  %p845_p12 = scmp.lt.s32.totalorder %s839_s28, %s839_s28 }
  0x1f   :  { %p846_p13 = por %p845_p12, %p844_p11 }
  0x21   :  { %p847_p0 = pnand %p846_p13, %p840_p10 }
  0x23   :  { %850 = shalt.err (!%p847_p0)
}
  0x24   :  { %55 = dma.hbm_to_vmem [thread:$0]  %s1035_s3, 1024, %s50_s24, [#allocation6], %s878_s18, %s878_s18, %s879_s19  }
  0x25   :  { %s882_s30 = smov [#allocation8]  }
  0x26   :  { %s63_s11 = sshll.u32 %s882_s30, 4  ;;  %s64_s11 = int_to_ptr.vmem [resolvable:$true] %s63_s11 }
  0x27   :  { %s859_s12 = scalar_lea.vmem %s64_s11, 1024  ;;  %p864_p2 = scmp.lt.s32.totalorder %s64_s11, %s64_s11 }
  0x28   :  { %p860_p1 = scmp.ne.s32.totalorder %s64_s11, %s859_s12  ;;  %p865_p3 = scmp.lt.s32.totalorder %s859_s12, %s859_s12 }
  0x2a   :  { %p866_p4 = por %p865_p3, %p864_p2 }
  0x2c   :  { %p867_p5 = pnand %p866_p4, %p860_p1 }
  0x2e   :  { %870 = shalt.err (!%p867_p5)
}
  0x2f   :  { %69 = dma.hbm_to_vmem [thread:$0]  %s1037_s5, 1024, %s64_s11, [#allocation9], %s878_s18, %s878_s18, %s879_s19  }
  0x30   :  { %871 = dma.done.wait [#allocation4], 128  }
  0x31   :  { %872 = vsyncadd [#allocation4], 4294967168 }
  0x32   :  { %873 = dma.done.wait [#allocation6], 3072  }
  0x33   :  { %874 = vsyncadd [#allocation6], 4294964224 }
  0x34   :  { %875 = dma.done.wait [#allocation9], 1024  }
  0x35   :  { %876 = vsyncadd [#allocation9], 4294966272  ;;  %v883_v1 = vmov 0.0   ;;  %vm884_vm0 = vmmov 0   ;;  %v755_v2 = vld [vmem:[#allocation5 + $0x38] sm:$0xff]   ;;  %v756_v3 = vld [vmem:[#allocation5 + $0x30] sm:$0xff]  }
  0x36   :  { %665 = vmatprep.subr.bf16.mxu0 %v883_v1  ;;  %681 = vmatprep.mubr.msk.bf16.mxu0 %vm884_vm0, %v883_v1  ;;  %v757_v4 = vld [vmem:[#allocation5 + $0x28] sm:$0xff]   ;;  %v758_v5 = vld [vmem:[#allocation5 + $0x20] sm:$0xff]   ;;  %v759_v6 = vld [vmem:[#allocation5 + $0x18] sm:$0xff]   ;;  %vm580_vm1 = vcmask 7168  }
  0x37   :  { %685 = vmatprep.subr.bf16.mxu1 %v883_v1  ;;  %701 = vmatprep.mubr.msk.bf16.mxu1 %vm884_vm0, %v883_v1  ;;  %v771_v7 = vld [vmem:[#allocation5 + $0x78] sm:$0xff]   ;;  %v760_v8 = vld [vmem:[#allocation5 + $0x10] sm:$0xff]   ;;  %v761_v10 = vld [vmem:[#allocation5 + $0x8] sm:$0xff]  }
  0x38   :  { %666 = vmatpush3.bf16.msra.mxu0 %v755_v2  ;;  %686 = vmatpush3.bf16.msra.mxu1 %v771_v7  ;;  %v772_v9 = vld [vmem:[#allocation5 + $0x70] sm:$0xff]   ;;  %v773_v11 = vld [vmem:[#allocation5 + $0x68] sm:$0xff]   ;;  %v762_v12 = vld [vmem:[#allocation5] sm:$0xff]  }
  0x39   :  { %667 = vmatprep.subr.bf16.mxu0 %v883_v1  ;;  %687 = vmatprep.subr.bf16.mxu1 %v883_v1  ;;  %v977_v13 = vld [vmem:[#allocation3] sm:$0xff]  ;;  %v774_v14 = vld [vmem:[#allocation5 + $0x60] sm:$0xff]   ;;  %v764_v18 = vld [vmem:[#allocation7 + $0x30] sm:$0xff]  }
  0x3a   :  { %v92_v15 = vpack.c.bf16 %v977_v13, %v977_v13  ;;  %v763_v16 = vld [vmem:[#allocation7 + $0x38] sm:$0xff]   ;;  %v776_v19 = vld [vmem:[#allocation5 + $0x50] sm:$0xff]   ;;  %v765_v20 = vld [vmem:[#allocation7 + $0x28] sm:$0xff]  }
  0x3b   :  { %v775_v17 = vld [vmem:[#allocation5 + $0x58] sm:$0xff]   ;;  %v766_v21 = vld [vmem:[#allocation7 + $0x20] sm:$0xff]   ;;  %v768_v23 = vld [vmem:[#allocation7 + $0x10] sm:$0xff]  }
  0x3c   :  { %668 = vmatpush3.bf16.msra.mxu0 %v756_v3  ;;  %688 = vmatpush3.bf16.msra.mxu1 %v772_v9  ;;  %v767_v22 = vld [vmem:[#allocation7 + $0x18] sm:$0xff]   ;;  %v769_v24 = vld [vmem:[#allocation7 + $0x8] sm:$0xff]   ;;  %v770_v25 = vld [vmem:[#allocation7] sm:$0xff]  }
  0x3d   :  { %669 = vmatprep.subr.bf16.mxu0 %v883_v1  ;;  %689 = vmatprep.subr.bf16.mxu1 %v883_v1  ;;  %v777_v26 = vld [vmem:[#allocation5 + $0x48] sm:$0xff]   ;;  %v778_v27 = vld [vmem:[#allocation5 + $0x40] sm:$0xff]   ;;  %v597_v29 = vld [vmem:[%s1034_s2] ss:$0 sm:$0xff] }
  0x3e   :  { %v779_v36 = vld [vmem:[#allocation8 + $0x38] sm:$0xff]   ;;  %v780_v38 = vld [vmem:[#allocation8 + $0x30] sm:$0xff]   ;;  %v781_v39 = vld [vmem:[#allocation8 + $0x28] sm:$0xff]  }
  0x3f   :  { %v782_v40 = vld [vmem:[#allocation8 + $0x20] sm:$0xff]   ;;  %v783_v41 = vld [vmem:[#allocation8 + $0x18] sm:$0xff]   ;;  %v784_v42 = vld [vmem:[#allocation8 + $0x10] sm:$0xff]  }
  0x40   :  { %670 = vmatpush3.bf16.msra.mxu0 %v757_v4  ;;  %690 = vmatpush3.bf16.msra.mxu1 %v773_v11  ;;  %v608_v43 = vld [vmem:[%s1036_s4] ss:$0 sm:$0xff]  ;;  %v785_v44 = vld [vmem:[#allocation8 + $0x8] sm:$0xff]   ;;  %v786_v48 = vld [vmem:[#allocation8] sm:$0xff]  }
  0x41   :  { %671 = vmatprep.subr.bf16.mxu0 %v883_v1  ;;  %691 = vmatprep.subr.bf16.mxu1 %v883_v1  ;;  %v549_v53 = vld [vmem:[#allocation2] sm:$0x1]  ;;  %v607_v55 = vld [vmem:[%s1034_s2 + $0x1] ss:$0 sm:$0xff] }
  0x42   :  { %745 = vpush %v549_v53  ;;  %v626_v60 = vld [vmem:[%s1039_s7] ss:$0 sm:$0xff] }
  0x43   :  { %v617_v0 = vld [vmem:[%s1038_s6] ss:$0 sm:$0xff] }
  0x44   :  { %672 = vmatpush3.bf16.msra.mxu0 %v758_v5  ;;  %692 = vmatpush3.bf16.msra.mxu1 %v774_v14  ;;  %v627_v4 = vld [vmem:[%s1040_s8] ss:$0 sm:$0xff] }
  0x45   :  { %673 = vmatprep.subr.bf16.mxu0 %v883_v1  ;;  %693 = vmatprep.subr.bf16.mxu1 %v883_v1 }
  0x48   :  { %674 = vmatpush3.bf16.msra.mxu0 %v759_v6  ;;  %694 = vmatpush3.bf16.msra.mxu1 %v775_v17 }
  0x49   :  { %675 = vmatprep.subr.bf16.mxu0 %v883_v1  ;;  %695 = vmatprep.subr.bf16.mxu1 %v883_v1 }
  0x4c   :  { %676 = vmatpush3.bf16.msra.mxu0 %v760_v8  ;;  %696 = vmatpush3.bf16.msra.mxu1 %v776_v19 }
  0x4d   :  { %677 = vmatprep.subr.bf16.mxu0 %v883_v1  ;;  %697 = vmatprep.subr.bf16.mxu1 %v883_v1 }
  0x50   :  { %678 = vmatpush3.bf16.msra.mxu0 %v761_v10  ;;  %698 = vmatpush3.bf16.msra.mxu1 %v777_v26 }
  0x51   :  { %679 = vmatprep.subr.bf16.mxu0 %v883_v1  ;;  %699 = vmatprep.subr.bf16.mxu1 %v883_v1 }
  0x54   :  { %680 = vmatpush3.bf16.msra.mxu0 %v762_v12  ;;  %700 = vmatpush3.bf16.msra.mxu1 %v778_v27 }
  0x55   :  { %705 = vmatprep.subr.bf16.mxu0 %v883_v1  ;;  %725 = vmatprep.subr.bf16.mxu1 %v883_v1 }
  0x57   :  { %682 = vmatmul.mubr.bf16.vlgmr.msra.gmra.mxu0 %v92_v15 }
  0x58   :  { %706 = vmatpush3.bf16.msra.mxu0 %v763_v16  ;;  %721 = vmatprep.mubr.msk.bf16.mxu0 %vm884_vm0, %v883_v1 }
  0x59   :  { %707 = vmatprep.subr.bf16.mxu0 %v883_v1 }
  0x5c   :  { %708 = vmatpush3.bf16.msra.mxu0 %v764_v18 }
  0x5d   :  { %709 = vmatprep.subr.bf16.mxu0 %v883_v1 }
  0x60   :  { %710 = vmatpush3.bf16.msra.mxu0 %v765_v20 }
  0x61   :  { %711 = vmatprep.subr.bf16.mxu0 %v883_v1 }
  0x64   :  { %712 = vmatpush3.bf16.msra.mxu0 %v766_v21 }
  0x65   :  { %713 = vmatprep.subr.bf16.mxu0 %v883_v1 }
  0x68   :  { %714 = vmatpush3.bf16.msra.mxu0 %v767_v22 }
  0x69   :  { %715 = vmatprep.subr.bf16.mxu0 %v883_v1 }
  0x6c   :  { %716 = vmatpush3.bf16.msra.mxu0 %v768_v23 }
  0x6d   :  { %717 = vmatprep.subr.bf16.mxu0 %v883_v1 }
  0x70   :  { %718 = vmatpush3.bf16.msra.mxu0 %v769_v24 }
  0x71   :  { %719 = vmatprep.subr.bf16.mxu0 %v883_v1 }
  0x73   :  { %s746_s7 = spop %745 }
  0x74   :  { %720 = vmatpush3.bf16.msra.mxu0 %v770_v25  ;;  %v572_v11 = vstv %s746_s7 }
  0x77   :  { %722 = vmatmul.mubr.bf16.vlgmr.msra.gmra.mxu0 %v92_v15 }
 0x117   :  { %v191_v28 = vpop.f32.mrf.mxu0 }
 0x118   :  { %v197_v30 = vmul.f32 %v191_v28, %v977_v13 }
 0x119   :  { %v683_v31 = vpop.f32.mrf.mxu0 }
 0x11a   :  { %v205_v32 = vadd.f32 %v597_v29, %v197_v30 }
 0x11b   :  { %v194_v33 = vpop.f32.mrf.mxu0 }
 0x11c   :  { %v206_v34 = vadd.f32 %v205_v32, %v977_v13 }
 0x11d   :  { %v684_v35 = vpop.f32.mrf.mxu0 }
 0x11e   :  { %v207_v37 = vpack.c.bf16 %v206_v34, %v206_v34 }
 0x120   :  { %702 = vmatmul.mubr.bf16.vlgmr.msra.gmra.mxu1 %v207_v37 }
 0x121   :  { %726 = vmatpush3.bf16.msra.mxu1 %v779_v36  ;;  %741 = vmatprep.mubr.msk.bf16.mxu1 %vm884_vm0, %v883_v1 }
 0x122   :  { %727 = vmatprep.subr.bf16.mxu1 %v883_v1 }
 0x125   :  { %728 = vmatpush3.bf16.msra.mxu1 %v780_v38 }
 0x126   :  { %729 = vmatprep.subr.bf16.mxu1 %v883_v1 }
 0x129   :  { %730 = vmatpush3.bf16.msra.mxu1 %v781_v39 }
 0x12a   :  { %731 = vmatprep.subr.bf16.mxu1 %v883_v1 }
 0x12d   :  { %732 = vmatpush3.bf16.msra.mxu1 %v782_v40 }
 0x12e   :  { %733 = vmatprep.subr.bf16.mxu1 %v883_v1 }
 0x131   :  { %734 = vmatpush3.bf16.msra.mxu1 %v783_v41 }
 0x132   :  { %735 = vmatprep.subr.bf16.mxu1 %v883_v1 }
 0x135   :  { %736 = vmatpush3.bf16.msra.mxu1 %v784_v42 }
 0x136   :  { %737 = vmatprep.subr.bf16.mxu1 %v883_v1 }
 0x137   :  { %v429_v45 = vpop.f32.mrf.mxu0 }
 0x138   :  { %v430_v46 = vadd.f32 %v608_v43, %v429_v45 }
 0x139   :  { %738 = vmatpush3.bf16.msra.mxu1 %v785_v44  ;;  %v723_v47 = vpop.f32.mrf.mxu0 }
 0x13a   :  { %v435_v49 = vmax.f32 %v430_v46, 0.0  ;;  %739 = vmatprep.subr.bf16.mxu1 %v883_v1 }
 0x13b   :  { %v432_v50 = vpop.f32.mrf.mxu0 }
 0x13c   :  { %v436_v51 = vpack.c.bf16 %v435_v49, %v435_v49 }
 0x13d   :  { %740 = vmatpush3.bf16.msra.mxu1 %v786_v48  ;;  %v724_v52 = vpop.f32.mrf.mxu0 }
 0x140   :  { %742 = vmatmul.mubr.bf16.vlgmr.msra.gmra.mxu1 %v436_v51 }
 0x1e0   :  { %v307_v54 = vpop.f32.mrf.mxu1 }
 0x1e1   :  { %v313_v56 = vmul.f32 %v307_v54, %v977_v13 }
 0x1e2   :  { %v703_v57 = vpop.f32.mrf.mxu1 }
 0x1e3   :  { %v322_v58 = vadd.f32 %v607_v55, %v313_v56 }
 0x1e4   :  { %v310_v59 = vpop.f32.mrf.mxu1 }
 0x1e5   :  { %v323_v61 = vadd.f32 %v322_v58, %v206_v34 }
 0x1e6   :  { %v704_v62 = vpop.f32.mrf.mxu1 }
 0x1e7   :  { %v558_v63 = vmul.f32 %v626_v60, %v323_v61 }
 0x1e9   :  { %559 = vadd.xlane.f32.xlu0 %v558_v63 }
 0x200   :  { %v542_v1 = vpop.f32.mrf.mxu1 }
 0x201   :  { %v543_v2 = vadd.f32 %v617_v0, %v542_v1 }
 0x202   :  { %v743_v3 = vpop.f32.mrf.mxu1 }
 0x203   :  { %v548_v5 = vmax.f32 %v543_v2, 0.0 }
 0x204   :  { %v545_v6 = vpop.f32.mrf.mxu1 }
 0x205   :  { %v568_v7 = vmul.f32 %v627_v4, %v548_v5 }
 0x206   :  { %v744_v8 = vpop.f32.mrf.mxu1 }
 0x207   :  { %569 = vadd.xlane.f32.xlu0 %v568_v7 }
 0x272   :  { %v560_v9 = vpop.xlane.xlu0 %559 }
 0x290   :  { %v570_v10 = vpop.xlane.xlu0 %569 }
 0x291   :  { %v571_v12 = vadd.f32 %v570_v10, %v560_v9 }
 0x293   :  { %v573_v13 = vadd.f32 %v572_v11, %v571_v12 }
 0x295   :  { %v628_v14 = vmul.f32 -1.442695, %v573_v13 }
 0x297   :  { %787 = vpow2.f32 %v628_v14 }
 0x2a4   :  { %v788_v15 = vpop.eup %787 }
 0x2a5   :  { %v577_v16 = vadd.f32 1.0, %v788_v15 }
 0x2a7   :  { %789 = vrcp.f32 %v577_v16 }
 0x2b4   :  { %v790_v17 = vpop.eup %789 }
 0x2b5   :  { %581 = vst.msk [vmem:[%s1042_s10] sm:$0xff] %vm580_vm1, %v790_v17 }
 0x2b6   :  { %586 = vsyncpa [#allocation4], 1 }
 0x2b7   :  { %587 = vsyncpa [#allocation6], 1 }
 0x2b8   :  { %588 = vsyncpa [#allocation9], 1 }

</bundles_post_ra>
